<compile_context>
chip_gen: v7x
topology: tpu7x:2x2x1
jax: 0.10.0
libtpu: 0.0.40
codegen_flags: <defaults>
</compile_context>

<pallas_src>
import jax
import jax.numpy as jnp
from jax import lax
from jax.experimental import pallas as pl
from jax.experimental.pallas import tpu as pltpu


def _fused_kernel(eps, rows):
    inv_rows = 1.0 / float(rows)

    def kernel(x_ref, s_ref, w_ref, g_ref, b_ref, o_ref, mean_ref, var_ref):
        # x_ref : (Cin, rows)   bf16   rows = N*H*W (pure reshape of NCHW)
        # s_ref : (1, Cin)      f32    pre-sigmoid per-channel gate (x236)
        # w_ref : (Cout, Cin)   bf16   1x1 conv weight in native OIHW layout
        # g_ref : (Cout, 1)     f32    BN gamma
        # b_ref : (Cout, 1)     f32    BN beta
        # o_ref : (Cout, rows)  bf16 (or requested out dtype)
        # mean_ref / var_ref : (Cout, 1) f32 batch statistics (for running stats)

        # Fold the sigmoid gate into the (smaller) weight operand.
        # Elementwise math stays f32 (v5e VPU/EUP have no bf16 path); bf16 is used
        # strictly for the MXU operands.
        gate = jax.nn.sigmoid(s_ref[...])                      # (1, Cin), f32
        w_gated = w_ref[...].astype(jnp.float32) * gate        # (Cout, Cin), f32

        # 1x1 conv == W @ X on the MXU; bf16 operands, f32 accumulation.
        y = jnp.dot(
            w_gated.astype(jnp.bfloat16),
            x_ref[...],                                        # already bf16 from HBM
            preferred_element_type=jnp.float32,
        )                                                      # (Cout, rows), f32

        # BatchNorm2d (training): biased batch stats over (N, H, W) == lane axis.
        sum_y = jnp.sum(y, axis=1, keepdims=True)              # (Cout, 1)
        sum_y2 = jnp.sum(y * y, axis=1, keepdims=True)         # (Cout, 1)
        mean = sum_y * inv_rows
        var = sum_y2 * inv_rows - mean * mean                  # biased variance
        inv_std = lax.rsqrt(var + eps)

        scale = inv_std * g_ref[...]                           # (Cout, 1)
        shift = b_ref[...] - mean * scale                      # (Cout, 1)
        o_ref[...] = (y * scale + shift).astype(o_ref.dtype)

        mean_ref[...] = mean
        var_ref[...] = var

    return kernel


def fused_sigmoid_mul_conv_bn(x_nchw, s_nc11, w_oihw, gamma, beta,
                              eps=1e-3, out_dtype=jnp.bfloat16):
    """x_nchw: (N, Cin, H, W) bf16; s_nc11: (1, Cin, 1, 1); w_oihw: (Cout, Cin, 1, 1) bf16.

    Returns (out_nchw, batch_mean, batch_var_biased)."""
    N, Cin, H, W = x_nchw.shape
    Cout = w_oihw.shape[0]
    rows = N * H * W

    # Channels-major 2-D slab: (Cin, rows). For N == 1 this is a pure reshape.
    if N == 1:
        x2d = x_nchw.reshape(Cin, rows)
    else:
        x2d = jnp.transpose(x_nchw, (1, 0, 2, 3)).reshape(Cin, rows)

    s2d = s_nc11.reshape(1, Cin).astype(jnp.float32)
    w2d = w_oihw.reshape(Cout, Cin)          # keep stored (bf16) dtype; no wrapper cast
    g2d = gamma.reshape(Cout, 1).astype(jnp.float32)
    b2d = beta.reshape(Cout, 1).astype(jnp.float32)

    isz = lambda d: jnp.dtype(d).itemsize
    bytes_accessed = (
        Cin * rows * isz(x2d.dtype)          # x
        + Cout * Cin * isz(w2d.dtype)        # weight
        + Cin * 4                            # gate logits
        + 2 * Cout * 4                       # gamma, beta
        + Cout * rows * isz(out_dtype)       # activations out
        + 2 * Cout * 4                       # mean, var out
    )
    cost = pl.CostEstimate(
        flops=2 * rows * Cin * Cout,
        transcendentals=Cin + Cout,
        bytes_accessed=int(bytes_accessed),
    )

    out2d, mean, var = pl.pallas_call(
        _fused_kernel(eps, rows),
        out_shape=(
            jax.ShapeDtypeStruct((Cout, rows), out_dtype),
            jax.ShapeDtypeStruct((Cout, 1), jnp.float32),
            jax.ShapeDtypeStruct((Cout, 1), jnp.float32),
        ),
        grid=(1,),
        in_specs=[
            pl.BlockSpec((Cin, rows), lambda i: (0, 0)),
            pl.BlockSpec((1, Cin), lambda i: (0, 0)),
            pl.BlockSpec((Cout, Cin), lambda i: (0, 0)),
            pl.BlockSpec((Cout, 1), lambda i: (0, 0)),
            pl.BlockSpec((Cout, 1), lambda i: (0, 0)),
        ],
        out_specs=(
            pl.BlockSpec((Cout, rows), lambda i: (0, 0)),
            pl.BlockSpec((Cout, 1), lambda i: (0, 0)),
            pl.BlockSpec((Cout, 1), lambda i: (0, 0)),
        ),
        compiler_params=pltpu.CompilerParams(
            dimension_semantics=("arbitrary",)
        ),
        cost_estimate=cost,
    )(x2d, s2d, w2d, g2d, b2d)

    # (Cout, rows) -> NCHW. For N == 1 this is again a pure reshape.
    if N == 1:
        out = out2d.reshape(1, Cout, H, W)
    else:
        out = jnp.transpose(out2d.reshape(Cout, N, H, W), (1, 0, 2, 3))
    return out, mean.reshape(Cout), var.reshape(Cout)


def update_running_stats(running_mean, running_var, batch_mean, batch_var_biased,
                         rows, momentum=0.01):
    """PyTorch BatchNorm2d train-mode buffer update (unbiased var, momentum)."""
    unbiased_var = batch_var_biased * (float(rows) / float(rows - 1))
    new_mean = (1.0 - momentum) * running_mean + momentum * batch_mean
    new_var = (1.0 - momentum) * running_var + momentum * unbiased_var
    return new_mean, new_var


def _reference(x_nchw_f32, s_nc11, w_oihw_f32, gamma, beta, eps=1e-3):
    gate = jax.nn.sigmoid(s_nc11)
    xs = gate * x_nchw_f32
    y = lax.conv_general_dilated(
        xs, w_oihw_f32, window_strides=(1, 1), padding="VALID",
        dimension_numbers=("NCHW", "OIHW", "NCHW"),
    )
    mean = jnp.mean(y, axis=(0, 2, 3), keepdims=True)
    var = jnp.mean((y - mean) ** 2, axis=(0, 2, 3), keepdims=True)
    out = (y - mean) * lax.rsqrt(var + eps) * gamma.reshape(1, -1, 1, 1) \
        + beta.reshape(1, -1, 1, 1)
    return out, mean.reshape(-1), var.reshape(-1)


if __name__ == "__main__":
    # Shapes taken directly from the module.
    N, Cin, H, W, Cout = 1, 768, 14, 14, 128
    rows = N * H * W
    eps = 1e-3
    momentum = 0.01

    key = jax.random.PRNGKey(0)
    k1, k2, k3 = jax.random.split(key, 3)

    # Producer emits bf16 activations; conv weight stored as a bf16 parameter.
    x232 = jax.random.normal(k1, (N, Cin, H, W), dtype=jnp.float32).astype(jnp.bfloat16)
    x236 = jax.random.normal(k2, (1, Cin, 1, 1), dtype=jnp.float32)
    conv_w = (jax.random.normal(k3, (Cout, Cin, 1, 1), dtype=jnp.float32) * 0.02
              ).astype(jnp.bfloat16)
    bn_gamma = jnp.ones((Cout,), dtype=jnp.float32)    # PyTorch BatchNorm defaults
    bn_beta = jnp.zeros((Cout,), dtype=jnp.float32)
    running_mean = jnp.zeros((Cout,), dtype=jnp.float32)
    running_var = jnp.ones((Cout,), dtype=jnp.float32)

    out, batch_mean, batch_var = fused_sigmoid_mul_conv_bn(
        x232, x236, conv_w, bn_gamma, bn_beta, eps)
    out = jax.block_until_ready(out)
    new_rm, new_rv = update_running_stats(
        running_mean, running_var, batch_mean, batch_var, rows, momentum)

    # Reference in full f32 on the same (bf16-valued) inputs.
    ref_out, ref_mean, ref_var = _reference(
        x232.astype(jnp.float32), x236, conv_w.astype(jnp.float32),
        bn_gamma, bn_beta, eps)
    ref_rm, ref_rv = update_running_stats(
        running_mean, running_var, ref_mean, ref_var, rows, momentum)

    assert out.shape == (N, Cout, H, W), out.shape
    # bf16 MXU operands + bf16 output store introduce small rounding noise on the
    # unit-scale normalized activations; stats stay f32.
    max_err = float(jnp.max(jnp.abs(out.astype(jnp.float32) - ref_out)))
    assert max_err < 5e-2, f"activation mismatch vs reference: max abs err {max_err}"
    stat_err = max(float(jnp.max(jnp.abs(batch_mean - ref_mean))),
                   float(jnp.max(jnp.abs(batch_var - ref_var))))
    assert stat_err < 1e-2, f"batch-stat mismatch vs reference: {stat_err}"
    run_err = max(float(jnp.max(jnp.abs(new_rm - ref_rm))),
                  float(jnp.max(jnp.abs(new_rv - ref_rv))))
    assert run_err < 1e-2, f"running-stat mismatch vs reference: {run_err}"

    print("KERNEL_OK")
</pallas_src>

<mosaic_0001>
module attributes {stable_mosaic.version = 11 : i64} {
  func.func @kernel(%arg0: i32, %arg1: memref<768x196xbf16, #tpu.memory_space<vmem>>, %arg2: memref<1x768xf32, #tpu.memory_space<vmem>>, %arg3: memref<128x768xbf16, #tpu.memory_space<vmem>>, %arg4: memref<128x1xf32, #tpu.memory_space<vmem>>, %arg5: memref<128x1xf32, #tpu.memory_space<vmem>>, %arg6: memref<128x196xbf16, #tpu.memory_space<vmem>>, %arg7: memref<128x1xf32, #tpu.memory_space<vmem>>, %arg8: memref<128x1xf32, #tpu.memory_space<vmem>>) attributes {dimension_semantics = [#tpu.dimension_semantics<arbitrary>], iteration_bounds = array<i64: 1>, scalar_prefetch = 0 : i64, scratch_operands = 0 : i64, tpu.core_type = #tpu.core_type<tc>, window_params = [{pipeline_mode = #tpu.pipeline_mode<synchronous>, transform_indices = @transform_0, window_bounds = array<i64: 768, 196>}, {pipeline_mode = #tpu.pipeline_mode<synchronous>, transform_indices = @transform_1, window_bounds = array<i64: 1, 768>}, {pipeline_mode = #tpu.pipeline_mode<synchronous>, transform_indices = @transform_2, window_bounds = array<i64: 128, 768>}, {pipeline_mode = #tpu.pipeline_mode<synchronous>, transform_indices = @transform_3, window_bounds = array<i64: 128, 1>}, {pipeline_mode = #tpu.pipeline_mode<synchronous>, transform_indices = @transform_4, window_bounds = array<i64: 128, 1>}, {pipeline_mode = #tpu.pipeline_mode<synchronous>, transform_indices = @transform_5, window_bounds = array<i64: 128, 196>}, {pipeline_mode = #tpu.pipeline_mode<synchronous>, transform_indices = @transform_6, window_bounds = array<i64: 128, 1>}, {pipeline_mode = #tpu.pipeline_mode<synchronous>, transform_indices = @transform_7, window_bounds = array<i64: 128, 1>}]} {
    %c0 = arith.constant 0 : index
    %c0_0 = arith.constant 0 : index
    %0 = vector.load %arg2[%c0, %c0_0] : memref<1x768xf32, #tpu.memory_space<vmem>>, vector<1x768xf32>
    %1 = arith.negf %0 : vector<1x768xf32>
    %2 = math.exp %1 : vector<1x768xf32>
    %cst = arith.constant 1.000000e+00 : f32
    %3 = vector.broadcast %cst : f32 to vector<1x768xf32>
    %4 = arith.addf %3, %2 : vector<1x768xf32>
    %5 = arith.divf %3, %4 : vector<1x768xf32>
    %c0_1 = arith.constant 0 : index
    %c0_2 = arith.constant 0 : index
    %6 = vector.load %arg3[%c0_1, %c0_2] : memref<128x768xbf16, #tpu.memory_space<vmem>>, vector<128x768xbf16>
    %7 = arith.extf %6 : vector<128x768xbf16> to vector<128x768xf32>
    %8 = vector.broadcast %5 : vector<1x768xf32> to vector<128x768xf32>
    %9 = arith.mulf %7, %8 : vector<128x768xf32>
    %10 = arith.truncf %9 : vector<128x768xf32> to vector<128x768xbf16>
    %c0_3 = arith.constant 0 : index
    %c0_4 = arith.constant 0 : index
    %11 = vector.load %arg1[%c0_3, %c0_4] : memref<768x196xbf16, #tpu.memory_space<vmem>>, vector<768x196xbf16>
    %cst_5 = arith.constant dense<0.000000e+00> : vector<128x196xf32>
    %12 = tpu.matmul %10, %11, %cst_5 {dimension_numbers = #tpu.dot_dimension_numbers<[1], [0], [0], [1], [0, 0, 1, 1], [], []>} : vector<128x768xbf16>, vector<768x196xbf16>, vector<128x196xf32> -> vector<128x196xf32>
    %cst_6 = arith.constant dense<0.000000e+00> : vector<128xf32>
    %13 = vector.multi_reduction <add>, %12, %cst_6 [1] : vector<128x196xf32> to vector<128xf32>
    %14 = vector.shape_cast %13 : vector<128xf32> to vector<128x1xf32>
    %15 = arith.mulf %12, %12 : vector<128x196xf32>
    %cst_7 = arith.constant dense<0.000000e+00> : vector<128xf32>
    %16 = vector.multi_reduction <add>, %15, %cst_7 [1] : vector<128x196xf32> to vector<128xf32>
    %17 = vector.shape_cast %16 : vector<128xf32> to vector<128x1xf32>
    %cst_8 = arith.constant 0.00510204071 : f32
    %18 = vector.broadcast %cst_8 : f32 to vector<128x1xf32>
    %19 = arith.mulf %14, %18 : vector<128x1xf32>
    %cst_9 = arith.constant 0.00510204071 : f32
    %20 = vector.broadcast %cst_9 : f32 to vector<128x1xf32>
    %21 = arith.mulf %17, %20 : vector<128x1xf32>
    %22 = arith.mulf %19, %19 : vector<128x1xf32>
    %23 = arith.subf %21, %22 : vector<128x1xf32>
    %cst_10 = arith.constant 1.000000e-03 : f32
    %24 = vector.broadcast %cst_10 : f32 to vector<128x1xf32>
    %25 = arith.addf %23, %24 : vector<128x1xf32>
    %26 = math.rsqrt %25 : vector<128x1xf32>
    %c0_11 = arith.constant 0 : index
    %c0_12 = arith.constant 0 : index
    %27 = vector.load %arg4[%c0_11, %c0_12] : memref<128x1xf32, #tpu.memory_space<vmem>>, vector<128x1xf32>
    %28 = arith.mulf %26, %27 : vector<128x1xf32>
    %c0_13 = arith.constant 0 : index
    %c0_14 = arith.constant 0 : index
    %29 = vector.load %arg5[%c0_13, %c0_14] : memref<128x1xf32, #tpu.memory_space<vmem>>, vector<128x1xf32>
    %30 = arith.mulf %19, %28 : vector<128x1xf32>
    %31 = arith.subf %29, %30 : vector<128x1xf32>
    %32 = vector.broadcast %28 : vector<128x1xf32> to vector<128x196xf32>
    %33 = arith.mulf %12, %32 : vector<128x196xf32>
    %34 = vector.broadcast %31 : vector<128x1xf32> to vector<128x196xf32>
    %35 = arith.addf %33, %34 : vector<128x196xf32>
    %36 = arith.truncf %35 : vector<128x196xf32> to vector<128x196xbf16>
    %c0_15 = arith.constant 0 : index
    %c0_16 = arith.constant 0 : index
    %37 = vector.load %arg6[%c0_15, %c0_16] : memref<128x196xbf16, #tpu.memory_space<vmem>>, vector<128x196xbf16>
    tpu.vector_store %arg6[%c0_15, %c0_16], %36 {strides = array<i32>} : memref<128x196xbf16, #tpu.memory_space<vmem>>, vector<128x196xbf16>,
    %c0_17 = arith.constant 0 : index
    %c0_18 = arith.constant 0 : index
    %38 = vector.load %arg7[%c0_17, %c0_18] : memref<128x1xf32, #tpu.memory_space<vmem>>, vector<128x1xf32>
    tpu.vector_store %arg7[%c0_17, %c0_18], %19 {strides = array<i32>} : memref<128x1xf32, #tpu.memory_space<vmem>>, vector<128x1xf32>,
    %c0_19 = arith.constant 0 : index
    %c0_20 = arith.constant 0 : index
    %39 = vector.load %arg8[%c0_19, %c0_20] : memref<128x1xf32, #tpu.memory_space<vmem>>, vector<128x1xf32>
    tpu.vector_store %arg8[%c0_19, %c0_20], %23 {strides = array<i32>} : memref<128x1xf32, #tpu.memory_space<vmem>>, vector<128x1xf32>,
    return
  }
  func.func @transform_0(%arg0: i32) -> (i32, i32) {
    %c0_i32 = arith.constant 0 : i32
    %c0_i32_0 = arith.constant 0 : i32
    %c0_i32_1 = arith.constant 0 : i32
    return %c0_i32, %c0_i32_0 : i32, i32
  }
  func.func @transform_1(%arg0: i32) -> (i32, i32) {
    %c0_i32 = arith.constant 0 : i32
    %c0_i32_0 = arith.constant 0 : i32
    %c0_i32_1 = arith.constant 0 : i32
    return %c0_i32, %c0_i32_0 : i32, i32
  }
  func.func @transform_2(%arg0: i32) -> (i32, i32) {
    %c0_i32 = arith.constant 0 : i32
    %c0_i32_0 = arith.constant 0 : i32
    %c0_i32_1 = arith.constant 0 : i32
    return %c0_i32, %c0_i32_0 : i32, i32
  }
  func.func @transform_3(%arg0: i32) -> (i32, i32) {
    %c0_i32 = arith.constant 0 : i32
    %c0_i32_0 = arith.constant 0 : i32
    %c0_i32_1 = arith.constant 0 : i32
    return %c0_i32, %c0_i32_0 : i32, i32
  }
  func.func @transform_4(%arg0: i32) -> (i32, i32) {
    %c0_i32 = arith.constant 0 : i32
    %c0_i32_0 = arith.constant 0 : i32
    %c0_i32_1 = arith.constant 0 : i32
    return %c0_i32, %c0_i32_0 : i32, i32
  }
  func.func @transform_5(%arg0: i32) -> (i32, i32) {
    %c0_i32 = arith.constant 0 : i32
    %c0_i32_0 = arith.constant 0 : i32
    %c0_i32_1 = arith.constant 0 : i32
    return %c0_i32, %c0_i32_0 : i32, i32
  }
  func.func @transform_6(%arg0: i32) -> (i32, i32) {
    %c0_i32 = arith.constant 0 : i32
    %c0_i32_0 = arith.constant 0 : i32
    %c0_i32_1 = arith.constant 0 : i32
    return %c0_i32, %c0_i32_0 : i32, i32
  }
  func.func @transform_7(%arg0: i32) -> (i32, i32) {
    %c0_i32 = arith.constant 0 : i32
    %c0_i32_0 = arith.constant 0 : i32
    %c0_i32_1 = arith.constant 0 : i32
    return %c0_i32, %c0_i32_0 : i32, i32
  }
}

</mosaic_0001>

<bundles_post_ra>
// kernel: tpu_custom_call.1
= control target key start
LH: loop header
LB: loop body
LE: loop exit
PB: predicated region body
PF: predicated region fallthrough
CT: control target
= control target key end

     0   :  { %vm1264_vm0 = vcmask 556032   ;;  %vm1940_vm1 = vcmask 7168   ;;  %vm1921_vm2 = vcmask 1043456   ;;  %vm1922_vm3 = vcmask 556036   ;;  %s4076_s0 = inlined_call_operand.vmem [shape: bf16[768,196], index: 0, kind: input, shape index: {}]   ;;  %s4077_s1 = inlined_call_operand.vmem [shape: f32[1,768], index: 1, kind: input, shape index: {}]   ;;  %s4078_s2 = inlined_call_operand.vmem [shape: bf16[128,768], index: 2, kind: input, shape index: {}]   ;;  %s4079_s6 = inlined_call_operand.vmem [shape: f32[128,1], index: 6, kind: output, shape index: {1}]   ;;  %s4080_s7 = inlined_call_operand.vmem [shape: f32[128,1], index: 7, kind: output, shape index: {2}]   ;;  %s4081_s3 = inlined_call_operand.vmem [shape: f32[128,1], index: 3, kind: input, shape index: {}]   ;;  %s4082_s4 = inlined_call_operand.vmem [shape: f32[128,1], index: 4, kind: input, shape index: {}]   ;;  %s4083_s5 = inlined_call_operand.vmem [shape: bf16[128,196], index: 5, kind: output, shape index: {0}]  }
   0x1   :  { %v2213_v0 = vld [vmem:[%s4076_s0 + $0x4] ss:$8 sps:$4 sm:$0xff]   ;;  %v2217_v2 = vld [vmem:[%s4076_s0] ss:$8 sps:$4 sm:$0xff]   ;;  %v2219_v4 = vld [vmem:[%s4076_s0 + $0x14] ss:$8 sps:$4 sm:$0xff]  }
   0x2   :  { %v2215_v1 = vld [vmem:[%s4076_s0 + $0x104] ss:$8 sps:$4 sm:$0xff]   ;;  %925 = vmatprep.subr.bf16.mxu1 %v2213_v0  ;;  %v2218_v3 = vld [vmem:[%s4076_s0 + $0x100] ss:$8 sps:$4 sm:$0xff]   ;;  %v2221_v5 = vld [vmem:[%s4076_s0 + $0x114] ss:$8 sps:$4 sm:$0xff]   ;;  %v175_v0 = vlaneseq }
   0x3   :  { %1038 = vmatprep.subr.bf16.mxu0 %v2215_v1  ;;  %926 = vmatpush1.bf16.msra.mxu1 %v2217_v2  ;;  %v2223_v6 = vld [vmem:[%s4076_s0 + $0x10] ss:$8 sps:$4 sm:$0xff]   ;;  %v2225_v8 = vld [vmem:[%s4076_s0 + $0x24] ss:$8 sps:$4 sm:$0xff]   ;;  %v2229_v10 = vld [vmem:[%s4076_s0 + $0x20] ss:$8 sps:$4 sm:$0xff]  }
   0x4   :  { %1039 = vmatpush1.bf16.msra.mxu0 %v2218_v3  ;;  %927 = vmatprep.subr.bf16.mxu1 %v2219_v4  ;;  %v2224_v7 = vld [vmem:[%s4076_s0 + $0x110] ss:$8 sps:$4 sm:$0xff]   ;;  %v2227_v9 = vld [vmem:[%s4076_s0 + $0x124] ss:$8 sps:$4 sm:$0xff]   ;;  %v2230_v11 = vld [vmem:[%s4076_s0 + $0x120] ss:$8 sps:$4 sm:$0xff]  }
   0x5   :  { %1040 = vmatprep.subr.bf16.mxu0 %v2221_v5  ;;  %v2231_v12 = vld [vmem:[%s4076_s0 + $0x34] ss:$8 sps:$4 sm:$0xff]   ;;  %v2235_v14 = vld [vmem:[%s4076_s0 + $0x30] ss:$8 sps:$4 sm:$0xff]   ;;  %v2237_v16 = vld [vmem:[%s4076_s0 + $0x44] ss:$8 sps:$4 sm:$0xff]  }
   0x6   :  { %v2233_v13 = vld [vmem:[%s4076_s0 + $0x134] ss:$8 sps:$4 sm:$0xff]   ;;  %v2236_v15 = vld [vmem:[%s4076_s0 + $0x130] ss:$8 sps:$4 sm:$0xff]   ;;  %v2239_v17 = vld [vmem:[%s4076_s0 + $0x144] ss:$8 sps:$4 sm:$0xff]  }
   0x7   :  { %928 = vmatpush1.bf16.msra.mxu1 %v2223_v6  ;;  %v2241_v18 = vld [vmem:[%s4076_s0 + $0x40] ss:$8 sps:$4 sm:$0xff]   ;;  %v2243_v20 = vld [vmem:[%s4076_s0 + $0x54] ss:$8 sps:$4 sm:$0xff]   ;;  %v2247_v22 = vld [vmem:[%s4076_s0 + $0x50] ss:$8 sps:$4 sm:$0xff]  }
   0x8   :  { %1041 = vmatpush1.bf16.msra.mxu0 %v2224_v7  ;;  %929 = vmatprep.subr.bf16.mxu1 %v2225_v8  ;;  %v2242_v19 = vld [vmem:[%s4076_s0 + $0x140] ss:$8 sps:$4 sm:$0xff]   ;;  %v2245_v21 = vld [vmem:[%s4076_s0 + $0x154] ss:$8 sps:$4 sm:$0xff]   ;;  %v2248_v23 = vld [vmem:[%s4076_s0 + $0x150] ss:$8 sps:$4 sm:$0xff]  }
   0x9   :  { %1042 = vmatprep.subr.bf16.mxu0 %v2227_v9  ;;  %v2249_v24 = vld [vmem:[%s4076_s0 + $0x64] ss:$8 sps:$4 sm:$0xff]   ;;  %v2253_v26 = vld [vmem:[%s4076_s0 + $0x60] ss:$8 sps:$4 sm:$0xff]   ;;  %v2255_v28 = vld [vmem:[%s4076_s0 + $0x74] ss:$8 sps:$4 sm:$0xff]  }
   0xa   :  { %v2251_v25 = vld [vmem:[%s4076_s0 + $0x164] ss:$8 sps:$4 sm:$0xff]   ;;  %v2254_v27 = vld [vmem:[%s4076_s0 + $0x160] ss:$8 sps:$4 sm:$0xff]   ;;  %v2257_v29 = vld [vmem:[%s4076_s0 + $0x174] ss:$8 sps:$4 sm:$0xff]  }
   0xb   :  { %930 = vmatpush1.bf16.msra.mxu1 %v2229_v10  ;;  %v2259_v30 = vld [vmem:[%s4076_s0 + $0x70] ss:$8 sps:$4 sm:$0xff]   ;;  %v2261_v32 = vld [vmem:[%s4076_s0 + $0x84] ss:$8 sps:$4 sm:$0xff]   ;;  %v2265_v34 = vld [vmem:[%s4076_s0 + $0x80] ss:$8 sps:$4 sm:$0xff]  }
   0xc   :  { %1043 = vmatpush1.bf16.msra.mxu0 %v2230_v11  ;;  %931 = vmatprep.subr.bf16.mxu1 %v2231_v12  ;;  %v2260_v31 = vld [vmem:[%s4076_s0 + $0x170] ss:$8 sps:$4 sm:$0xff]   ;;  %v2263_v33 = vld [vmem:[%s4076_s0 + $0x184] ss:$8 sps:$4 sm:$0xff]   ;;  %v2266_v35 = vld [vmem:[%s4076_s0 + $0x180] ss:$8 sps:$4 sm:$0xff]  }
   0xd   :  { %1044 = vmatprep.subr.bf16.mxu0 %v2233_v13  ;;  %v2267_v36 = vld [vmem:[%s4076_s0 + $0x94] ss:$8 sps:$4 sm:$0xff]   ;;  %v2271_v38 = vld [vmem:[%s4076_s0 + $0x90] ss:$8 sps:$4 sm:$0xff]   ;;  %v2273_v40 = vld [vmem:[%s4076_s0 + $0xa4] ss:$8 sps:$4 sm:$0xff]  }
   0xe   :  { %v2269_v37 = vld [vmem:[%s4076_s0 + $0x194] ss:$8 sps:$4 sm:$0xff]   ;;  %v2272_v39 = vld [vmem:[%s4076_s0 + $0x190] ss:$8 sps:$4 sm:$0xff]   ;;  %v2275_v41 = vld [vmem:[%s4076_s0 + $0x1a4] ss:$8 sps:$4 sm:$0xff]  }
   0xf   :  { %932 = vmatpush1.bf16.msra.mxu1 %v2235_v14  ;;  %v2277_v42 = vld [vmem:[%s4076_s0 + $0xa0] ss:$8 sps:$4 sm:$0xff]   ;;  %v2279_v44 = vld [vmem:[%s4076_s0 + $0xb4] ss:$8 sps:$4 sm:$0xff]   ;;  %v2283_v47 = vld [vmem:[%s4076_s0 + $0xb0] ss:$8 sps:$4 sm:$0xff]  }
  0x10   :  { %1045 = vmatpush1.bf16.msra.mxu0 %v2236_v15  ;;  %933 = vmatprep.subr.bf16.mxu1 %v2237_v16  ;;  %v2278_v43 = vld [vmem:[%s4076_s0 + $0x1a0] ss:$8 sps:$4 sm:$0xff]   ;;  %v2281_v45 = vld [vmem:[%s4076_s0 + $0x1b4] ss:$8 sps:$4 sm:$0xff]   ;;  %v2284_v49 = vld [vmem:[%s4076_s0 + $0x1b0] ss:$8 sps:$4 sm:$0xff]  }
  0x11   :  { %1046 = vmatprep.subr.bf16.mxu0 %v2239_v17  ;;  %v23_v46 = vld [vmem:[%s4077_s1] sm:$0x3f]  ;;  %v2291_v54 = vld [vmem:[%s4076_s0 + $0xd4] ss:$8 sps:$4 sm:$0xff]   ;;  %v2295_v56 = vld [vmem:[%s4076_s0 + $0xd0] ss:$8 sps:$4 sm:$0xff]  }
  0x12   :  { %v1985_v48 = vmul.f32 -1.442695, %v23_v46  ;;  %v2285_v50 = vld [vmem:[%s4076_s0 + $0xc4] ss:$8 sps:$4 sm:$0xff]   ;;  %v2289_v52 = vld [vmem:[%s4076_s0 + $0xc0] ss:$8 sps:$4 sm:$0xff]   ;;  %vm3966_vm4 = vmor %vm1922_vm3, %vm1921_vm2 }
  0x13   :  { %934 = vmatpush1.bf16.msra.mxu1 %v2241_v18  ;;  %v2287_v51 = vld [vmem:[%s4076_s0 + $0x1c4] ss:$8 sps:$4 sm:$0xff]   ;;  %v2290_v53 = vld [vmem:[%s4076_s0 + $0x1c0] ss:$8 sps:$4 sm:$0xff]   ;;  %v2293_v55 = vld [vmem:[%s4076_s0 + $0x1d4] ss:$8 sps:$4 sm:$0xff]  }
  0x14   :  { %1047 = vmatpush1.bf16.msra.mxu0 %v2242_v19  ;;  %935 = vmatprep.subr.bf16.mxu1 %v2243_v20  ;;  %2357 = vpow2.f32 %v1985_v48  ;;  %v2296_v57 = vld [vmem:[%s4076_s0 + $0x1d0] ss:$8 sps:$4 sm:$0xff]   ;;  %v2297_v58 = vld [vmem:[%s4076_s0 + $0xe4] ss:$8 sps:$4 sm:$0xff]   ;;  %v2301_v61 = vld [vmem:[%s4076_s0 + $0xe0] ss:$8 sps:$4 sm:$0xff]  }
  0x15   :  { %1048 = vmatprep.subr.bf16.mxu0 %v2245_v21  ;;  %v2299_v59 = vld [vmem:[%s4076_s0 + $0x1e4] ss:$8 sps:$4 sm:$0xff]   ;;  %v2302_v62 = vld [vmem:[%s4076_s0 + $0x1e0] ss:$8 sps:$4 sm:$0xff]   ;;  %v2303_v1 = vld [vmem:[%s4076_s0 + $0xf4] ss:$8 sps:$4 sm:$0xff]  }
  0x16   :  { %v2305_v2 = vld [vmem:[%s4076_s0 + $0x1f4] ss:$8 sps:$4 sm:$0xff]   ;;  %v2307_v3 = vld [vmem:[%s4076_s0 + $0xf0] ss:$8 sps:$4 sm:$0xff]   ;;  %v2629_v5 = vshrl.u32 %v175_v0, 7  ;;  %v30_v6 = vld [vmem:[%s4078_s2] sm:$0xff] }
  0x17   :  { %936 = vmatpush1.bf16.msra.mxu1 %v2247_v22  ;;  %v2308_v4 = vld [vmem:[%s4076_s0 + $0x1f0] ss:$8 sps:$4 sm:$0xff]   ;;  %v2311_v7 = vld [vmem:[%s4076_s0 + $0x204] ss:$8 sps:$4 sm:$0xff]   ;;  %v78_v17 = vunpack.c.l.bf16 %v30_v6  ;;  %v79_v18 = vunpack.c.h.bf16 %v30_v6 }
  0x18   :  { %1049 = vmatpush1.bf16.msra.mxu0 %v2248_v23  ;;  %937 = vmatprep.subr.bf16.mxu1 %v2249_v24  ;;  %v33_v8 = vld [vmem:[%s4078_s2 + $0x18] sm:$0xff]  ;;  %v31_v9 = vld [vmem:[%s4078_s2 + $0x8] sm:$0xff]  ;;  %v34_v10 = vld [vmem:[%s4078_s2 + $0x20] sm:$0xff]  ;;  %v181_v13 = vsub.s32 1, %v2629_v5  ;;  %v189_v14 = vsub.s32 3, %v2629_v5  ;;  %v177_v15 = vsub.s32 0, %v2629_v5 }
  0x19   :  { %1050 = vmatprep.subr.bf16.mxu0 %v2251_v25  ;;  %v36_v11 = vld [vmem:[%s4078_s2 + $0x30] sm:$0xff]  ;;  %v39_v12 = vld [vmem:[%s4078_s2 + $0x48] sm:$0xff]  ;;  %v2658_v16 = vld [vmem:[%s4078_s2 + $0x38] sm:$0xff]  ;;  %v84_v19 = vunpack.c.l.bf16 %v33_v8  ;;  %v185_v20 = vsub.s32 2, %v2629_v5  ;;  %v85_v22 = vunpack.c.h.bf16 %v33_v8  ;;  %v80_v23 = vunpack.c.l.bf16 %v31_v9 }
  0x1a   :  { %v40_v21 = vld [vmem:[%s4078_s2 + $0x50] sm:$0xff]  ;;  %v81_v24 = vunpack.c.h.bf16 %v31_v9  ;;  %v86_v25 = vunpack.c.l.bf16 %v34_v10 }
  0x1b   :  { %938 = vmatpush1.bf16.msra.mxu1 %v2253_v26  ;;  %v87_v26 = vunpack.c.h.bf16 %v34_v10  ;;  %v2729_v6 = vld [vmem:[%s4078_s2 + $0x90] sm:$0xff] }
  0x1c   :  { %1051 = vmatpush1.bf16.msra.mxu0 %v2254_v27  ;;  %939 = vmatprep.subr.bf16.mxu1 %v2255_v28  ;;  %v91_v27 = vunpack.c.h.bf16 %v36_v11  ;;  %v97_v28 = vunpack.c.h.bf16 %v39_v12 }
  0x1d   :  { %1052 = vmatprep.subr.bf16.mxu0 %v2257_v29  ;;  %v93_v29 = vunpack.c.h.bf16 %v2658_v16 }
  0x1e   :  { %v2358_v60 = vpop.eup %2357 }
  0x1f   :  { %940 = vmatpush1.bf16.msra.mxu1 %v2259_v30  ;;  %v27_v63 = vadd.f32 1.0, %v2358_v60  ;;  %v2668_v30 = vld [vmem:[%s4078_s2 + $0x60] sm:$0xff] }
  0x20   :  { %1053 = vmatpush1.bf16.msra.mxu0 %v2260_v31  ;;  %941 = vmatprep.subr.bf16.mxu1 %v2261_v32  ;;  %v2673_v31 = vld [vmem:[%s4078_s2 + $0x78] sm:$0xff]  ;;  %v2678_v32 = vld [vmem:[%s4078_s2 + $0x68] sm:$0xff] }
  0x21   :  { %1054 = vmatprep.subr.bf16.mxu0 %v2263_v33  ;;  %2359 = vrcp.f32 %v27_v63 }
  0x23   :  { %942 = vmatpush1.bf16.msra.mxu1 %v2265_v34  ;;  %v99_v34 = vunpack.c.h.bf16 %v40_v21 }
  0x24   :  { %1055 = vmatpush1.bf16.msra.mxu0 %v2266_v35  ;;  %943 = vmatprep.subr.bf16.mxu1 %v2267_v36  ;;  %v90_v35 = vunpack.c.l.bf16 %v36_v11  ;;  %v96_v36 = vunpack.c.l.bf16 %v39_v12  ;;  %v2741_v11 = vld [vmem:[%s4078_s2 + $0x98] sm:$0xff]  ;;  %v193_v12 = vsub.s32 4, %v2629_v5 }
  0x25   :  { %1056 = vmatprep.subr.bf16.mxu0 %v2269_v37  ;;  %v92_v37 = vunpack.c.l.bf16 %v2658_v16  ;;  %v104_v16 = vunpack.c.l.bf16 %v2678_v32 }
  0x27   :  { %944 = vmatpush1.bf16.msra.mxu1 %v2271_v38 }
  0x28   :  { %1057 = vmatpush1.bf16.msra.mxu0 %v2272_v39  ;;  %945 = vmatprep.subr.bf16.mxu1 %v2273_v40 }
  0x29   :  { %1058 = vmatprep.subr.bf16.mxu0 %v2275_v41 }
  0x2b   :  { %946 = vmatpush1.bf16.msra.mxu1 %v2277_v42  ;;  %v2680_v33 = vpop.eup %2359  ;;  %v98_v42 = vunpack.c.l.bf16 %v40_v21 }
  0x2c   :  { %1059 = vmatpush1.bf16.msra.mxu0 %v2278_v43  ;;  %947 = vmatprep.subr.bf16.mxu1 %v2279_v44  ;;  %v2684_v38 = vrot.slane %v2680_v33, %v181_v13  ;;  %v2687_v39 = vrot.slane %v2680_v33, %v189_v14  ;;  %v2690_v40 = vrot.slane %v2680_v33, %v177_v15  ;;  %v103_v43 = vunpack.c.h.bf16 %v2668_v30  ;;  %v2312_v13 = vld [vmem:[%s4076_s0 + $0x210] ss:$8 sps:$4 sm:$0xff]  }
  0x2d   :  { %1060 = vmatprep.subr.bf16.mxu0 %v2281_v45  ;;  %v2693_v41 = vrot.slane %v2680_v33, %v185_v20  ;;  %v109_v44 = vunpack.c.h.bf16 %v2673_v31  ;;  %v105_v45 = vunpack.c.h.bf16 %v2678_v32  ;;  %v102_v14 = vunpack.c.l.bf16 %v2668_v30  ;;  %v2782_v30 = vld [vmem:[%s4078_s2 + $0xc8] sm:$0xff] }
  0x2e   :  { %v206_v46 = vmul.f32 %v2684_v38, %v79_v18  ;;  %v208_v48 = vmul.f32 %v2687_v39, %v81_v24  ;;  %v220_v63 = vmul.f32 %v2687_v39, %v93_v29  ;;  %v226_v0 = vmul.f32 %v2687_v39, %v99_v34  ;;  %v2768_v24 = vld [vmem:[%s4078_s2 + $0xc0] sm:$0xff]  ;;  %v2777_v29 = vld [vmem:[%s4078_s2 + $0xd8] sm:$0xff] }
  0x2f   :  { %948 = vmatpush1.bf16.msra.mxu1 %v2283_v47  ;;  %v212_v47 = vmul.f32 %v2684_v38, %v85_v22  ;;  %v219_v9 = vmul.f32 %v2693_v41, %v92_v37  ;;  %v225_v10 = vmul.f32 %v2693_v41, %v98_v42  ;;  %v108_v15 = vunpack.c.l.bf16 %v2673_v31  ;;  %v2787_v31 = vld [vmem:[%s4078_s2 + $0xe0] sm:$0xff]  ;;  %v2320_v42 = vld [vmem:[%s4076_s0 + $0x234] ss:$8 sps:$4 sm:$0xff]  }
  0x30   :  { %1061 = vmatpush1.bf16.msra.mxu0 %v2284_v49  ;;  %949 = vmatprep.subr.bf16.mxu1 %v2285_v50  ;;  %v214_v49 = vmul.f32 %v2687_v39, %v87_v26  ;;  %v205_v50 = vmul.f32 %v2690_v40, %v78_v17  ;;  %v310_v8 = vpack.c.bf16 %v226_v0, %v220_v63  ;;  %v2753_v17 = vld [vmem:[%s4078_s2 + $0xb0] sm:$0xff]  ;;  %v197_v18 = vsub.s32 5, %v2629_v5  ;;  %v2315_v37 = vld [vmem:[%s4076_s0 + $0x220] ss:$8 sps:$4 sm:$0xff]   ;;  %v2323_v0 = vld [vmem:[%s4076_s0 + $0x244] ss:$8 sps:$4 sm:$0xff]  }
  0x31   :  { %1062 = vmatprep.subr.bf16.mxu0 %v2287_v51  ;;  %v211_v51 = vmul.f32 %v2690_v40, %v84_v19  ;;  %v2317_v19 = vld [vmem:[%s4076_s0 + $0x224] ss:$8 sps:$4 sm:$0xff]   ;;  %v2760_v20 = vmul.f32 %v2684_v38, %v103_v43  ;;  %v115_v22 = vunpack.c.h.bf16 %v2729_v6  ;;  %v232_v26 = vmul.f32 %v2687_v39, %v105_v45  ;;  %v2318_v63 = vld [vmem:[%s4076_s0 + $0x230] ss:$8 sps:$4 sm:$0xff]  }
  0x32   :  { %v309_v34 = vpack.c.bf16 %v225_v10, %v219_v9  ;;  %v122_v45 = vunpack.c.l.bf16 %v2753_v17  ;;  %v2850_v10 = vld [vmem:[%s4078_s2 + $0x120] sm:$0xff]  ;;  %v71_v5 = vld [vmem:[%s4078_s2 + $0x148] sm:$0xff] }
  0x33   :  { %950 = vmatpush1.bf16.msra.mxu1 %v2289_v52  ;;  %v207_v52 = vmul.f32 %v2693_v41, %v80_v23  ;;  %v301_v60 = vpack.c.bf16 %v211_v51, %v205_v50  ;;  %v126_v50 = vunpack.c.l.bf16 %v2768_v24  ;;  %v2809_v51 = vld [vmem:[%s4078_s2 + $0xf0] sm:$0xff] }
  0x34   :  { %1063 = vmatpush1.bf16.msra.mxu0 %v2290_v53  ;;  %951 = vmatprep.subr.bf16.mxu1 %v2291_v54  ;;  %v213_v53 = vmul.f32 %v2693_v41, %v86_v25  ;;  %v2709_v54 = vld [vmem:[%s4078_s2 + $0x80] sm:$0xff]  ;;  %v236_v25 = vmul.f32 %v2684_v38, %v109_v44  ;;  %v116_v44 = vunpack.c.l.bf16 %v2741_v11  ;;  %v138_v9 = vunpack.c.l.bf16 %v2809_v51 }
  0x35   :  { %1064 = vmatprep.subr.bf16.mxu0 %v2293_v55  ;;  %v302_v55 = vpack.c.bf16 %v212_v47, %v206_v46  ;;  %v110_v21 = vunpack.c.l.bf16 %v2709_v54  ;;  %v127_v46 = vunpack.c.h.bf16 %v2768_v24  ;;  %v133_v47 = vunpack.c.h.bf16 %v2777_v29 }
  0x37   :  { %952 = vmatpush1.bf16.msra.mxu1 %v2295_v56  ;;  %v304_v56 = vpack.c.bf16 %v214_v49, %v208_v48  ;;  %957 = vmatprep.mubr.bf16.mxu1 %v302_v55  ;;  %v129_v48 = vunpack.c.h.bf16 %v2782_v30  ;;  %v135_v49 = vunpack.c.h.bf16 %v2787_v31 }
  0x38   :  { %1065 = vmatpush1.bf16.msra.mxu0 %v2296_v57  ;;  %953 = vmatprep.subr.bf16.mxu1 %v2297_v58  ;;  %v2309_v57 = vld [vmem:[%s4076_s0 + $0x200] ss:$8 sps:$4 sm:$0xff]   ;;  %v218_v58 = vmul.f32 %v2684_v38, %v91_v27 }
  0x39   :  { %1066 = vmatprep.subr.bf16.mxu0 %v2299_v59  ;;  %v224_v59 = vmul.f32 %v2684_v38, %v97_v28  ;;  %1070 = vmatprep.mubr.bf16.mxu0 %v304_v56  ;;  %v117_v28 = vunpack.c.h.bf16 %v2741_v11  ;;  %v229_v56 = vmul.f32 %v2690_v40, %v102_v14  ;;  %v2860_v14 = vld [vmem:[%s4078_s2 + $0x128] sm:$0xff] }
  0x3b   :  { %954 = vmatpush1.bf16.msra.mxu1 %v2301_v61  ;;  %v303_v61 = vpack.c.bf16 %v213_v53, %v207_v52  ;;  %v2814_v52 = vld [vmem:[%s4078_s2 + $0x108] sm:$0xff]  ;;  %v2819_v53 = vld [vmem:[%s4078_s2 + $0xf8] sm:$0xff] }
  0x3c   :  { %1067 = vmatpush1.bf16.msra.mxu0 %v2302_v62  ;;  %955 = vmatprep.subr.bf16.mxu1 %v2303_v1  ;;  %v2314_v62 = vld [vmem:[%s4076_s0 + $0x214] ss:$8 sps:$4 sm:$0xff]   ;;  %v308_v1 = vpack.c.bf16 %v224_v59, %v218_v58  ;;  %v235_v59 = vmul.f32 %v2690_v40, %v108_v15  ;;  %v244_v15 = vmul.f32 %v2687_v39, %v117_v28 }
  0x3d   :  { %1068 = vmatprep.subr.bf16.mxu0 %v2305_v2  ;;  %v2722_v2 = vmul.f32 %v2690_v40, %v90_v35  ;;  %v123_v35 = vunpack.c.h.bf16 %v2753_v17  ;;  %v2827_v58 = vld [vmem:[%s4078_s2 + $0x110] sm:$0xff]  ;;  %v2911_v17 = vmul.f32 %v2684_v38, %v133_v47  ;;  %v2930_v47 = vmul.f32 %v2687_v39, %v135_v49 }
  0x3e   :  { %v146_v28 = vunpack.c.l.bf16 %v2827_v58 }
  0x3f   :  { %956 = vmatpush1.bf16.msra.mxu1 %v2307_v3  ;;  %v223_v3 = vmul.f32 %v2690_v40, %v96_v36  ;;  %v114_v36 = vunpack.c.l.bf16 %v2729_v6  ;;  %v242_v6 = vmul.f32 %v2684_v38, %v115_v22  ;;  %v313_v22 = vpack.c.bf16 %v235_v59, %v229_v56 }
  0x40   :  { %1069 = vmatpush1.bf16.msra.mxu0 %v2308_v4  ;;  %2114 = vmatprep.subr.bf16.mxu1 %v2311_v7  ;;  %v111_v4 = vunpack.c.h.bf16 %v2709_v54  ;;  %v314_v54 = vpack.c.bf16 %v236_v25, %v2760_v20  ;;  %v140_v20 = vunpack.c.l.bf16 %v2819_v53  ;;  %v243_v56 = vmul.f32 %v2693_v41, %v116_v44 }
  0x41   :  { %1151 = vmatprep.subr.bf16.mxu0 %v2311_v7  ;;  %v2734_v7 = vld [vmem:[%s4078_s2 + $0xa8] sm:$0xff]  ;;  %v307_v32 = vpack.c.bf16 %v223_v3, %v2722_v2  ;;  %v139_v2 = vunpack.c.h.bf16 %v2809_v51  ;;  %v145_v3 = vunpack.c.h.bf16 %v2814_v52  ;;  %v2872_v25 = vmul.f32 %v2690_v40, %v114_v36  ;;  %v2326_v36 = vld [vmem:[%s4076_s0 + $0x254] ss:$8 sps:$4 sm:$0xff]  }
  0x42   :  { %958 = vmatmul.mubr.bf16.vlgmr.msra.gmra.mrb[0].mxu1 %v301_v60  ;;  %v121_v23 = vunpack.c.h.bf16 %v2734_v7  ;;  %v238_v27 = vmul.f32 %v2687_v39, %v111_v4  ;;  %v120_v43 = vunpack.c.l.bf16 %v2734_v7  ;;  %v231_v60 = vmul.f32 %v2693_v41, %v104_v16 }
  0x43   :  { %1071 = vmatmul.mubr.bf16.vlgmr.msra.gmra.mrb[0].mxu0 %v303_v61  ;;  %2130 = vmatpush1.bf16.msra.mxu1 %v2309_v57  ;;  %v237_v61 = vmul.f32 %v2693_v41, %v110_v21  ;;  %v141_v4 = vunpack.c.h.bf16 %v2819_v53  ;;  %v250_v16 = vmul.f32 %v2687_v39, %v123_v35  ;;  %v2869_v21 = vld [vmem:[%s4078_s2 + $0x140] sm:$0xff]  ;;  %v153_v35 = vunpack.c.h.bf16 %v2860_v14 }
  0x44   :  { %1152 = vmatpush1.bf16.msra.mxu0 %v2309_v57  ;;  %2115 = vmatprep.subr.bf16.mxu1 %v2314_v62  ;;  %v316_v55 = vpack.c.bf16 %v238_v27, %v232_v26  ;;  %v132_v57 = vunpack.c.l.bf16 %v2777_v29  ;;  %v248_v7 = vmul.f32 %v2684_v38, %v121_v23  ;;  %v2875_v26 = vmul.f32 %v2690_v40, %v120_v43  ;;  %v2321_v27 = vld [vmem:[%s4076_s0 + $0x240] ss:$8 sps:$4 sm:$0xff]  }
  0x45   :  { %1153 = vmatprep.subr.bf16.mxu0 %v2314_v62  ;;  %967 = vmatprep.mubr.bf16.mxu1 %v308_v1  ;;  %v128_v62 = vunpack.c.l.bf16 %v2782_v30  ;;  %v134_v1 = vunpack.c.l.bf16 %v2787_v31  ;;  %v315_v23 = vpack.c.bf16 %v237_v61, %v231_v60  ;;  %v150_v43 = vunpack.c.l.bf16 %v2850_v10  ;;  %v2904_v60 = vld [vmem:[%s4078_s2 + $0x150] sm:$0xff]  ;;  %v2329_v31 = vld [vmem:[%s4076_s0 + $0x264] ss:$8 sps:$4 sm:$0xff]  }
  0x46   :  { %1080 = vmatprep.mubr.bf16.mxu0 %v310_v8  ;;  %v147_v8 = vunpack.c.h.bf16 %v2827_v58  ;;  %v249_v58 = vmul.f32 %v2693_v41, %v122_v45  ;;  %v2899_v59 = vmul.f32 %v2684_v38, %v127_v46  ;;  %v319_v11 = vpack.c.bf16 %v2875_v26, %v2872_v25  ;;  %v2922_v46 = vld [vmem:[%s4078_s2 + $0x168] sm:$0xff]  ;;  %v2324_v61 = vld [vmem:[%s4076_s0 + $0x250] ss:$8 sps:$4 sm:$0xff]  }
  0x47   :  { %2131 = vmatpush1.bf16.msra.mxu1 %v2312_v13  ;;  %v2916_v44 = vmul.f32 %v2687_v39, %v129_v48  ;;  %v152_v45 = vunpack.c.l.bf16 %v2860_v14  ;;  %v2935_v48 = vmul.f32 %v2690_v40, %v126_v50  ;;  %v2949_v24 = vmul.f32 %v2693_v41, %v128_v62 }
  0x48   :  { %1154 = vmatpush1.bf16.msra.mxu0 %v2312_v13  ;;  %2116 = vmatprep.subr.bf16.mxu1 %v2317_v19  ;;  %v2855_v13 = vld [vmem:[%s4078_s2 + $0x138] sm:$0xff]  ;;  %v2952_v49 = vmul.f32 %v2693_v41, %v134_v1  ;;  %v2955_v29 = vmul.f32 %v2684_v38, %v139_v2  ;;  %v163_v50 = vunpack.c.h.bf16 %v2904_v60  ;;  %v2966_v30 = vmul.f32 %v2684_v38, %v145_v3 }
  0x49   :  { %1155 = vmatprep.subr.bf16.mxu0 %v2317_v19  ;;  %v144_v19 = vunpack.c.l.bf16 %v2814_v52  ;;  %v2971_v62 = vmul.f32 %v2687_v39, %v141_v4  ;;  %v2974_v1 = vmul.f32 %v2687_v39, %v147_v8  ;;  %v169_v2 = vunpack.c.h.bf16 %v2922_v46  ;;  %v2327_v4 = vld [vmem:[%s4076_s0 + $0x260] ss:$8 sps:$4 sm:$0xff]  }
  0x4a   :  { %968 = vmatmul.mubr.bf16.gmra.mrb[4].mxu1 %v307_v32  ;;  %v151_v32 = vunpack.c.h.bf16 %v2850_v10  ;;  %v326_v52 = vpack.c.bf16 %v2911_v17, %v2899_v59  ;;  %v2987_v53 = vmul.f32 %v2690_v40, %v138_v9  ;;  %v328_v8 = vpack.c.bf16 %v2930_v47, %v2916_v44  ;;  %v3072_v47 = vld [vmem:[%s4078_s2 + $0x88] sm:$0xff] }
  0x4b   :  { %1081 = vmatmul.mubr.bf16.gmra.mrb[4].mxu0 %v309_v34  ;;  %2132 = vmatpush1.bf16.msra.mxu1 %v2315_v37  ;;  %v157_v34 = vunpack.c.h.bf16 %v2855_v13  ;;  %v2990_v3 = vmul.f32 %v2690_v40, %v144_v19  ;;  %v3001_v51 = vmul.f32 %v2693_v41, %v146_v28  ;;  %v3010_v19 = vld [vmem:[%s4078_s2 + $0x58] sm:$0xff]  ;;  %v327_v28 = vpack.c.bf16 %v2952_v49, %v2949_v24 }
  0x4c   :  { %1156 = vmatpush1.bf16.msra.mxu0 %v2315_v37  ;;  %2117 = vmatprep.subr.bf16.mxu1 %v2320_v42  ;;  %v320_v37 = vpack.c.bf16 %v248_v7, %v242_v6  ;;  %v2980_v6 = vld [vmem:[%s4078_s2 + $0x170] sm:$0xff]  ;;  %v321_v7 = vpack.c.bf16 %v249_v58, %v243_v56  ;;  %v3046_v56 = vmul.f32 %v2687_v39, %v153_v35  ;;  %v101_v59 = vunpack.c.h.bf16 %v3010_v19 }
  0x4d   :  { %1157 = vmatprep.subr.bf16.mxu0 %v2320_v42  ;;  %977 = vmatprep.mubr.bf16.mxu1 %v314_v54  ;;  %v159_v42 = vunpack.c.h.bf16 %v2869_v21  ;;  %v156_v54 = vunpack.c.l.bf16 %v2855_v13  ;;  %v3021_v25 = vmul.f32 %v2684_v38, %v157_v34  ;;  %v65_v34 = vld [vmem:[%s4078_s2 + $0x118] sm:$0xff]  ;;  %v3067_v44 = vmul.f32 %v2690_v40, %v150_v43 }
  0x4e   :  { %1090 = vmatprep.mubr.bf16.mxu0 %v316_v55  ;;  %v322_v55 = vpack.c.bf16 %v250_v16, %v244_v15  ;;  %v2998_v15 = vmul.f32 %v2693_v41, %v140_v20  ;;  %v38_v16 = vld [vmem:[%s4078_s2 + $0x40] sm:$0xff]  ;;  %v2332_v20 = vld [vmem:[%s4076_s0 + $0x274] ss:$8 sps:$4 sm:$0xff]   ;;  %v3082_v10 = vrot.slane %v2680_v33, %v197_v18  ;;  %v149_v43 = vunpack.c.h.bf16 %v65_v34 }
  0x4f   :  { %2133 = vmatpush1.bf16.msra.mxu1 %v2318_v63  ;;  %v95_v58 = vunpack.c.h.bf16 %v38_v16  ;;  %v3062_v35 = vmul.f32 %v2687_v39, %v159_v42  ;;  %v100_v24 = vunpack.c.l.bf16 %v3010_v19 }
  0x50   :  { %1158 = vmatpush1.bf16.msra.mxu0 %v2318_v63  ;;  %2118 = vmatprep.subr.bf16.mxu1 %v2323_v0  ;;  %v2940_v63 = vmul.f32 %v2690_v40, %v132_v57  ;;  %v2961_v57 = vld [vmem:[%s4078_s2 + $0x158] sm:$0xff]  ;;  %v333_v17 = vpack.c.bf16 %v3001_v51, %v2998_v15  ;;  %v296_v51 = vmul.f32 %v2684_v38, %v169_v2  ;;  %v32_v2 = vld [vmem:[%s4078_s2 + $0x10] sm:$0xff] }
  0x51   :  { %1159 = vmatprep.subr.bf16.mxu0 %v2323_v0  ;;  %v158_v0 = vunpack.c.l.bf16 %v2869_v21  ;;  %v3098_v18 = vmul.f32 %v3082_v10, %v95_v58  ;;  %v340_v13 = vpack.c.bf16 %v3062_v35, %v3046_v56  ;;  %v3123_v58 = vmul.f32 %v3082_v10, %v149_v43  ;;  %v74_v43 = vld [vmem:[%s4078_s2 + $0x160] sm:$0xff] }
  0x52   :  { %978 = vmatmul.mubr.bf16.gmra.mrb[8].mxu1 %v313_v22  ;;  %v325_v22 = vpack.c.bf16 %v2940_v63, %v2935_v48  ;;  %v2335_v48 = vld [vmem:[%s4076_s0 + $0x284] ss:$8 sps:$4 sm:$0xff]   ;;  %v94_v63 = vunpack.c.l.bf16 %v38_v16  ;;  %v2333_v16 = vld [vmem:[%s4076_s0 + $0x280] ss:$8 sps:$4 sm:$0xff]   ;;  %v164_v35 = vunpack.c.l.bf16 %v2961_v57 }
  0x53   :  { %1091 = vmatmul.mubr.bf16.gmra.mrb[8].mxu0 %v315_v23  ;;  %2134 = vmatpush1.bf16.msra.mxu1 %v2321_v27  ;;  %v3018_v23 = vmul.f32 %v2684_v38, %v151_v32  ;;  %v3036_v32 = vrot.slane %v2680_v33, %v193_v12  ;;  %v3052_v12 = vld [vmem:[%s4078_s2 + $0x70] sm:$0xff]  ;;  %v3095_v33 = vmul.f32 %v2690_v40, %v156_v54  ;;  %v2347_v21 = vld [vmem:[%s4076_s0 + $0x2c4] ss:$8 sps:$4 sm:$0xff]  }
  0x54   :  { %1160 = vmatpush1.bf16.msra.mxu0 %v2321_v27  ;;  %2119 = vmatprep.subr.bf16.mxu1 %v2326_v36  ;;  %v62_v27 = vld [vmem:[%s4078_s2 + $0x100] sm:$0xff]  ;;  %v3112_v54 = vmul.f32 %v2693_v41, %v152_v45  ;;  %v161_v45 = vunpack.c.h.bf16 %v71_v5 }
  0x55   :  { %1161 = vmatprep.subr.bf16.mxu0 %v2326_v36  ;;  %987 = vmatprep.mubr.bf16.mxu1 %v320_v37  ;;  %v332_v36 = vpack.c.bf16 %v2966_v30, %v2955_v29  ;;  %v334_v37 = vpack.c.bf16 %v2974_v1, %v2971_v62  ;;  %v338_v42 = vpack.c.bf16 %v3021_v25, %v3018_v23  ;;  %v142_v49 = vunpack.c.l.bf16 %v62_v27  ;;  %v2339_v62 = vld [vmem:[%s4076_s0 + $0x2a0] ss:$8 sps:$4 sm:$0xff]   ;;  %v56_v25 = vld [vmem:[%s4078_s2 + $0xd0] sm:$0xff] }
  0x56   :  { %1100 = vmatprep.mubr.bf16.mxu0 %v322_v55  ;;  %v331_v55 = vpack.c.bf16 %v2990_v3, %v2987_v53  ;;  %v3126_v14 = vmul.f32 %v3036_v32, %v94_v63  ;;  %v167_v29 = vunpack.c.h.bf16 %v74_v43  ;;  %v2342_v53 = vld [vmem:[%s4076_s0 + $0x2b0] ss:$8 sps:$4 sm:$0xff]   ;;  %v35_v23 = vld [vmem:[%s4078_s2 + $0x28] sm:$0xff] }
  0x57   :  { %2135 = vmatpush1.bf16.msra.mxu1 %v2324_v61 }
  0x58   :  { %1162 = vmatpush1.bf16.msra.mxu0 %v2324_v61  ;;  %2120 = vmatprep.subr.bf16.mxu1 %v2329_v31  ;;  %v143_v61 = vunpack.c.h.bf16 %v62_v27  ;;  %v2338_v27 = vld [vmem:[%s4076_s0 + $0x294] ss:$8 sps:$4 sm:$0xff]  }
  0x59   :  { %1163 = vmatprep.subr.bf16.mxu0 %v2329_v31  ;;  %v68_v31 = vld [vmem:[%s4078_s2 + $0x130] sm:$0xff] }
  0x5a   :  { %988 = vmatmul.mubr.bf16.gmra.mrb[12].mxu1 %v319_v11  ;;  %v2330_v11 = vld [vmem:[%s4076_s0 + $0x270] ss:$8 sps:$4 sm:$0xff]   ;;  %v3115_v19 = vmul.f32 %v3082_v10, %v143_v61 }
  0x5b   :  { %1101 = vmatmul.mubr.bf16.gmra.mrb[12].mxu0 %v321_v7  ;;  %2136 = vmatpush1.bf16.msra.mxu1 %v2327_v4  ;;  %v148_v7 = vunpack.c.l.bf16 %v65_v34  ;;  %v160_v34 = vunpack.c.l.bf16 %v71_v5 }
  0x5c   :  { %1164 = vmatpush1.bf16.msra.mxu0 %v2327_v4  ;;  %2121 = vmatprep.subr.bf16.mxu1 %v2332_v20  ;;  %v107_v4 = vunpack.c.h.bf16 %v3052_v12 }
  0x5d   :  { %1165 = vmatprep.subr.bf16.mxu0 %v2332_v20  ;;  %997 = vmatprep.mubr.bf16.mxu1 %v326_v52  ;;  %v3101_v52 = vmul.f32 %v3082_v10, %v101_v59  ;;  %v155_v20 = vunpack.c.h.bf16 %v68_v31  ;;  %v3129_v59 = vmul.f32 %v3036_v32, %v100_v24  ;;  %v3135_v61 = vmul.f32 %v3036_v32, %v148_v7  ;;  %v50_v7 = vld [vmem:[%s4078_s2 + $0xa0] sm:$0xff] }
  0x5e   :  { %1110 = vmatprep.mubr.bf16.mxu0 %v328_v8  ;;  %v113_v8 = vunpack.c.h.bf16 %v3072_v47  ;;  %v118_v5 = vunpack.c.l.bf16 %v50_v7 }
  0x5f   :  { %2137 = vmatpush1.bf16.msra.mxu1 %v2330_v11  ;;  %v3146_v24 = vmul.f32 %v3082_v10, %v155_v20  ;;  %v112_v20 = vunpack.c.l.bf16 %v3072_v47  ;;  %v154_v47 = vunpack.c.l.bf16 %v68_v31  ;;  %v3195_v31 = vmul.f32 %v3036_v32, %v160_v34  ;;  %v2344_v34 = vld [vmem:[%s4076_s0 + $0x2b4] ss:$8 sps:$4 sm:$0xff]  }
  0x60   :  { %1166 = vmatpush1.bf16.msra.mxu0 %v2330_v11  ;;  %2122 = vmatprep.subr.bf16.mxu1 %v2335_v48  ;;  %v3132_v11 = vmul.f32 %v3036_v32, %v142_v49  ;;  %v3143_v63 = vmul.f32 %v3082_v10, %v113_v8  ;;  %v106_v49 = vunpack.c.l.bf16 %v3052_v12  ;;  %v3163_v8 = vmul.f32 %v3082_v10, %v161_v45 }
  0x61   :  { %1167 = vmatprep.subr.bf16.mxu0 %v2335_v48  ;;  %v3138_v48 = vmul.f32 %v3082_v10, %v107_v4  ;;  %v2341_v4 = vld [vmem:[%s4076_s0 + $0x2a4] ss:$8 sps:$4 sm:$0xff]   ;;  %v3189_v26 = vmul.f32 %v3036_v32, %v112_v20  ;;  %v119_v45 = vunpack.c.h.bf16 %v50_v7  ;;  %v3214_v20 = vmul.f32 %v3082_v10, %v167_v29 }
  0x62   :  { %998 = vmatmul.mubr.bf16.gmra.mrb[16].mxu1 %v325_v22  ;;  %v53_v22 = vld [vmem:[%s4078_s2 + $0xb8] sm:$0xff]  ;;  %v3178_v12 = vmul.f32 %v3036_v32, %v106_v49  ;;  %v3192_v49 = vmul.f32 %v3036_v32, %v154_v47  ;;  %v3222_v7 = vmul.f32 %v3036_v32, %v118_v5 }
  0x63   :  { %1111 = vmatmul.mubr.bf16.gmra.mrb[16].mxu0 %v327_v28  ;;  %2138 = vmatpush1.bf16.msra.mxu1 %v2333_v16  ;;  %v2336_v28 = vld [vmem:[%s4076_s0 + $0x290] ss:$8 sps:$4 sm:$0xff]   ;;  %v125_v9 = vunpack.c.h.bf16 %v53_v22 }
  0x64   :  { %1168 = vmatpush1.bf16.msra.mxu0 %v2333_v16  ;;  %v77_v16 = vld [vmem:[%s4078_s2 + $0x178] sm:$0xff]  ;;  %2123 = vmatprep.subr.bf16.mxu1 %v2338_v27 }
  0x65   :  { %1169 = vmatprep.subr.bf16.mxu0 %v2338_v27  ;;  %1007 = vmatprep.mubr.bf16.mxu1 %v332_v36  ;;  %v342_v27 = vpack.c.bf16 %v3163_v8, %v3146_v24  ;;  %v173_v30 = vunpack.c.h.bf16 %v77_v16  ;;  %v3203_v36 = vmul.f32 %v3082_v10, %v119_v45  ;;  %v124_v45 = vunpack.c.l.bf16 %v53_v22 }
  0x66   :  { %1120 = vmatprep.mubr.bf16.mxu0 %v334_v37  ;;  %v3206_v37 = vmul.f32 %v3082_v10, %v125_v9  ;;  %v172_v1 = vunpack.c.l.bf16 %v77_v16  ;;  %v285_v22 = vmul.f32 %v2693_v41, %v158_v0  ;;  %v290_v0 = vmul.f32 %v2684_v38, %v163_v50 }
  0x67   :  { %2139 = vmatpush1.bf16.msra.mxu1 %v2336_v28  ;;  %v3217_v47 = vmul.f32 %v3082_v10, %v173_v30  ;;  %v3236_v30 = vmul.f32 %v3036_v32, %v124_v45  ;;  %v4085_v16 = vunpack.c.h.bf16 %v2980_v6 }
  0x68   :  { %1170 = vmatpush1.bf16.msra.mxu0 %v2336_v28  ;;  %2124 = vmatprep.subr.bf16.mxu1 %v2341_v4  ;;  %v341_v28 = vpack.c.bf16 %v3195_v31, %v3192_v49  ;;  %v324_v9 = vpack.c.bf16 %v3206_v37, %v3203_v36  ;;  %v3245_v15 = vmul.f32 %v3036_v32, %v172_v1 }
  0x69   :  { %1171 = vmatprep.subr.bf16.mxu0 %v2341_v4  ;;  %v166_v4 = vunpack.c.l.bf16 %v74_v43  ;;  %v348_v29 = vpack.c.bf16 %v3217_v47, %v3214_v20  ;;  %v4084_v43 = vunpack.c.h.bf16 %v2961_v57  ;;  %v298_v38 = vmul.f32 %v2687_v39, %v4085_v16 }
  0x6a   :  { %1008 = vmatmul.mubr.bf16.gmra.mrb[20].mxu1 %v331_v55  ;;  %v162_v55 = vunpack.c.l.bf16 %v2904_v60  ;;  %v168_v60 = vunpack.c.l.bf16 %v2922_v46  ;;  %v339_v46 = vpack.c.bf16 %v285_v22, %v3112_v54  ;;  %v89_v57 = vunpack.c.h.bf16 %v35_v23 }
  0x6b   :  { %1121 = vmatmul.mubr.bf16.gmra.mrb[20].mxu0 %v333_v17  ;;  %2140 = vmatpush1.bf16.msra.mxu1 %v2339_v62  ;;  %v3242_v3 = vmul.f32 %v3036_v32, %v166_v4  ;;  %v323_v17 = vpack.c.bf16 %v3236_v30, %v3222_v7  ;;  %v292_v50 = vmul.f32 %v2687_v39, %v4084_v43  ;;  %v131_v54 = vunpack.c.h.bf16 %v56_v25 }
  0x6c   :  { %1172 = vmatpush1.bf16.msra.mxu0 %v2339_v62  ;;  %2125 = vmatprep.subr.bf16.mxu1 %v2344_v34  ;;  %v337_v39 = vpack.c.bf16 %v3095_v33, %v3067_v44  ;;  %v2345_v62 = vld [vmem:[%s4076_s0 + $0x2c0] ss:$8 sps:$4 sm:$0xff]   ;;  %v2350_v44 = vld [vmem:[%s4076_s0 + $0x2d4] ss:$8 sps:$4 sm:$0xff]   ;;  %v83_v33 = vunpack.c.h.bf16 %v32_v2  ;;  %v289_v5 = vmul.f32 %v2690_v40, %v162_v55  ;;  %v295_v45 = vmul.f32 %v2690_v40, %v168_v60 }
  0x6d   :  { %1173 = vmatprep.subr.bf16.mxu0 %v2344_v34  ;;  %1017 = vmatprep.mubr.bf16.mxu1 %v338_v42  ;;  %v347_v56 = vpack.c.bf16 %v3245_v15, %v3242_v3  ;;  %v170_v42 = vunpack.c.l.bf16 %v2980_v6  ;;  %v344_v6 = vpack.c.bf16 %v296_v51, %v290_v0  ;;  %v346_v1 = vpack.c.bf16 %v298_v38, %v292_v50 }
  0x6e   :  { %1130 = vmatprep.mubr.bf16.mxu0 %v340_v13  ;;  %v59_v13 = vld [vmem:[%s4078_s2 + $0xe8] sm:$0xff]  ;;  %v291_v4 = vmul.f32 %v2693_v41, %v164_v35  ;;  %v82_v0 = vunpack.c.l.bf16 %v32_v2  ;;  %v210_v51 = vmul.f32 %v3082_v10, %v83_v33  ;;  %v88_v40 = vunpack.c.l.bf16 %v35_v23  ;;  %v2356_v23 = vld [vmem:[%s4076_s0 + $0x2f4] ss:$8 sps:$4 sm:$0xff]  }
  0x6f   :  { %2141 = vmatpush1.bf16.msra.mxu1 %v2342_v53  ;;  %v137_v34 = vunpack.c.h.bf16 %v59_v13  ;;  %v297_v22 = vmul.f32 %v2693_v41, %v170_v42  ;;  %v216_v41 = vmul.f32 %v3082_v10, %v89_v57  ;;  %v258_v55 = vmul.f32 %v3082_v10, %v131_v54  ;;  %v2351_v2 = vld [vmem:[%s4076_s0 + $0x2e0] ss:$8 sps:$4 sm:$0xff]  }
  0x70   :  { %1174 = vmatpush1.bf16.msra.mxu0 %v2342_v53  ;;  %2126 = vmatprep.subr.bf16.mxu1 %v2347_v21  ;;  %v2348_v53 = vld [vmem:[%s4076_s0 + $0x2d0] ss:$8 sps:$4 sm:$0xff]   ;;  %v343_v50 = vpack.c.bf16 %v295_v45, %v289_v5  ;;  %v130_v38 = vunpack.c.l.bf16 %v56_v25  ;;  %v136_v60 = vunpack.c.l.bf16 %v59_v13  ;;  %v215_v25 = vmul.f32 %v3036_v32, %v88_v40 }
  0x71   :  { %1175 = vmatprep.subr.bf16.mxu0 %v2347_v21  ;;  %v2353_v21 = vld [vmem:[%s4076_s0 + $0x2e4] ss:$8 sps:$4 sm:$0xff]   ;;  %v264_v43 = vmul.f32 %v3082_v10, %v137_v34  ;;  %v345_v16 = vpack.c.bf16 %v297_v22, %v291_v4  ;;  %v2354_v13 = vld [vmem:[%s4076_s0 + $0x2f0] ss:$8 sps:$4 sm:$0xff]   ;;  %v4086_v33 = vpack.c.bf16 %v3101_v52, %v3098_v18  ;;  %v4088_v57 = vpack.c.bf16 %v3129_v59, %v3126_v14 }
  0x72   :  { %1018 = vmatmul.mubr.bf16.gmra.mrb[24].mxu1 %v337_v39  ;;  %v209_v39 = vmul.f32 %v3036_v32, %v82_v0  ;;  %v257_v35 = vmul.f32 %v3036_v32, %v130_v38  ;;  %v263_v42 = vmul.f32 %v3036_v32, %v136_v60  ;;  %v4087_v32 = vpack.c.bf16 %v3123_v58, %v3115_v19 }
  0x73   :  { %1131 = vmatmul.mubr.bf16.gmra.mrb[24].mxu0 %v339_v46  ;;  %2142 = vmatpush1.bf16.msra.mxu1 %v2345_v62  ;;  %v306_v46 = vpack.c.bf16 %v216_v41, %v210_v51  ;;  %v330_v10 = vpack.c.bf16 %v264_v43, %v258_v55  ;;  %v4089_v54 = vpack.c.bf16 %v3135_v61, %v3132_v11 }
  0x74   :  { %1176 = vmatpush1.bf16.msra.mxu0 %v2345_v62  ;;  %2127 = vmatprep.subr.bf16.mxu1 %v2350_v44  ;;  %v305_v62 = vpack.c.bf16 %v215_v25, %v209_v39  ;;  %v4091_v18 = vpack.c.bf16 %v3189_v26, %v3178_v12 }
  0x75   :  { %1177 = vmatprep.subr.bf16.mxu0 %v2350_v44  ;;  %1027 = vmatprep.mubr.bf16.mxu1 %v344_v6  ;;  %v329_v44 = vpack.c.bf16 %v263_v42, %v257_v35  ;;  %v4090_v6 = vpack.c.bf16 %v3143_v63, %v3138_v48 }
  0x76   :  { %1140 = vmatprep.mubr.bf16.mxu0 %v346_v1 }
  0x77   :  { %2143 = vmatpush1.bf16.msra.mxu1 %v2348_v53 }
  0x78   :  { %1178 = vmatpush1.bf16.msra.mxu0 %v2348_v53  ;;  %2128 = vmatprep.subr.bf16.mxu1 %v2353_v21 }
  0x79   :  { %1179 = vmatprep.subr.bf16.mxu0 %v2353_v21 }
  0x7a   :  { %1028 = vmatmul.mubr.bf16.gmra.mrb[28].mxu1 %v343_v50 }
  0x7b   :  { %1141 = vmatmul.mubr.bf16.gmra.mrb[28].mxu0 %v345_v16  ;;  %2144 = vmatpush1.bf16.msra.mxu1 %v2351_v2 }
  0x7c   :  { %1180 = vmatpush1.bf16.msra.mxu0 %v2351_v2  ;;  %2129 = vmatprep.subr.bf16.mxu1 %v2356_v23 }
  0x7d   :  { %1181 = vmatprep.subr.bf16.mxu0 %v2356_v23  ;;  %1183 = vmatprep.mubr.bf16.mxu0 %v306_v46 }
  0x7e   :  { %1223 = vmatprep.mubr.bf16.mxu1 %v330_v10 }
  0x7f   :  { %2145 = vmatpush1.bf16.msra.mxu1 %v2354_v13 }
  0x80   :  { %1182 = vmatpush1.bf16.msra.mxu0 %v2354_v13 }
  0x82   :  { %1224 = vmatmul.mubr.bf16.vlgmr.msra.gmra.mrb[32].mxu1 %v329_v44 }
  0x83   :  { %1184 = vmatmul.mubr.bf16.vlgmr.msra.gmra.mrb[0].mxu0 %v305_v62  ;;  %1233 = vmatprep.mubr.bf16.mxu1 %v4087_v32 }
  0x84   :  { %1193 = vmatprep.mubr.bf16.mxu0 %v4086_v33 }
  0x8a   :  { %1234 = vmatmul.mubr.bf16.gmra.mrb[36].mxu1 %v4089_v54 }
  0x8b   :  { %1194 = vmatmul.mubr.bf16.gmra.mrb[4].mxu0 %v4088_v57  ;;  %1243 = vmatprep.mubr.bf16.mxu1 %v342_v27 }
  0x8c   :  { %1203 = vmatprep.mubr.bf16.mxu0 %v4090_v6 }
  0x92   :  { %1244 = vmatmul.mubr.bf16.gmra.mrb[40].mxu1 %v341_v28 }
  0x93   :  { %1204 = vmatmul.mubr.bf16.gmra.mrb[8].mxu0 %v4091_v18  ;;  %1253 = vmatprep.mubr.bf16.mxu1 %v348_v29 }
  0x94   :  { %1213 = vmatprep.mubr.bf16.mxu0 %v324_v9 }
  0x9a   :  { %1254 = vmatmul.mubr.bf16.gmra.mrb[44].mxu1 %v347_v56 }
  0x9b   :  { %1214 = vmatmul.mubr.bf16.gmra.mrb[12].mxu0 %v323_v17 }
 0x115   :  { %v3360_v26 = vpop.f32.mrb[0].mxu1 }
 0x116   :  { %v3362_v52 = vpop.f32.mrb[1].mxu1 }
 0x117   :  { %v3364_v19 = vpop.f32.mrb[2].mxu1 }
 0x118   :  { %v3366_v58 = vpop.f32.mrb[3].mxu1 }
 0x11d   :  { %v3368_v14 = vpop.f32.mrb[4].mxu1 }
 0x11e   :  { %v3370_v59 = vpop.f32.mrb[5].mxu1 }
 0x11f   :  { %v3372_v11 = vpop.f32.mrb[6].mxu1 }
 0x120   :  { %v3374_v61 = vpop.f32.mrb[7].mxu1 }
 0x125   :  { %v3376_v48 = vpop.f32.mrb[8].mxu1 }
 0x126   :  { %v3378_v63 = vpop.f32.mrb[9].mxu1 }
 0x127   :  { %v3380_v24 = vpop.f32.mrb[10].mxu1 }
 0x128   :  { %v3382_v12 = vpop.f32.mrb[11].mxu1 }
 0x12d   :  { %v3384_v8 = vpop.f32.mrb[12].mxu1 }
 0x12e   :  { %v3386_v27 = vpop.f32.mrb[13].mxu1 }
 0x12f   :  { %v3388_v49 = vpop.f32.mrb[14].mxu1 }
 0x130   :  { %v3390_v31 = vpop.f32.mrb[15].mxu1 }
 0x135   :  { %v999_v36 = vpop.f32.mrb[16].mxu1 }
 0x136   :  { %v1112_v37 = vpop.f32.mrb[16].mxu0  ;;  %v1001_v20 = vpop.f32.mrb[17].mxu1 }
 0x137   :  { %v1113_v28 = vadd.f32 %v1112_v37, %v999_v36  ;;  %v1114_v47 = vpop.f32.mrb[17].mxu0  ;;  %v1003_v7 = vpop.f32.mrb[18].mxu1 }
 0x138   :  { %v1115_v9 = vadd.f32 %v1114_v47, %v1001_v20  ;;  %v1116_v29 = vpop.f32.mrb[18].mxu0  ;;  %v1005_v3 = vpop.f32.mrb[19].mxu1 }
 0x139   :  { %v1117_v30 = vadd.f32 %v1116_v29, %v1003_v7  ;;  %v1118_v15 = vpop.f32.mrb[19].mxu0 }
 0x13a   :  { %v1119_v17 = vadd.f32 %v1118_v15, %v1005_v3 }
 0x13d   :  { %v1009_v56 = vpop.f32.mrb[20].mxu1 }
 0x13e   :  { %v1122_v1 = vpop.f32.mrb[20].mxu0  ;;  %v1011_v34 = vpop.f32.mrb[21].mxu1 }
 0x13f   :  { %v3392_v5 = vadd.f32 %v1122_v1, %v1009_v56  ;;  %v1124_v45 = vpop.f32.mrb[21].mxu0  ;;  %v1013_v22 = vpop.f32.mrb[22].mxu1 }
 0x140   :  { %v3394_v4 = vadd.f32 %v1124_v45, %v1011_v34  ;;  %v1126_v53 = vpop.f32.mrb[22].mxu0  ;;  %v1015_v0 = vpop.f32.mrb[23].mxu1 }
 0x141   :  { %v3396_v21 = vadd.f32 %v1126_v53, %v1013_v22  ;;  %v1128_v51 = vpop.f32.mrb[23].mxu0 }
 0x142   :  { %v3398_v40 = vadd.f32 %v1128_v51, %v1015_v0 }
 0x145   :  { %v1019_v41 = vpop.f32.mrb[24].mxu1 }
 0x146   :  { %v1132_v55 = vpop.f32.mrb[24].mxu0  ;;  %v1021_v50 = vpop.f32.mrb[25].mxu1 }
 0x147   :  { %v3400_v43 = vadd.f32 %v1132_v55, %v1019_v41  ;;  %v1134_v16 = vpop.f32.mrb[25].mxu0  ;;  %v1023_v60 = vpop.f32.mrb[26].mxu1 }
 0x148   :  { %v3402_v38 = vadd.f32 %v1134_v16, %v1021_v50  ;;  %v1136_v2 = vpop.f32.mrb[26].mxu0  ;;  %v1025_v39 = vpop.f32.mrb[27].mxu1 }
 0x149   :  { %v3404_v23 = vadd.f32 %v1136_v2, %v1023_v60  ;;  %v1138_v46 = vpop.f32.mrb[27].mxu0 }
 0x14a   :  { %v3406_v10 = vadd.f32 %v1138_v46, %v1025_v39 }
 0x14d   :  { %v1029_v25 = vpop.f32.mrb[28].mxu1 }
 0x14e   :  { %v1142_v35 = vpop.f32.mrb[28].mxu0  ;;  %v1031_v13 = vpop.f32.mrb[29].mxu1 }
 0x14f   :  { %v3408_v42 = vadd.f32 %v1142_v35, %v1029_v25  ;;  %v1144_v62 = vpop.f32.mrb[29].mxu0  ;;  %v1033_v33 = vpop.f32.mrb[30].mxu1 }
 0x150   :  { %v3410_v44 = vadd.f32 %v1144_v62, %v1031_v13  ;;  %v1146_v32 = vpop.f32.mrb[30].mxu0  ;;  %v1035_v54 = vpop.f32.mrb[31].mxu1 }
 0x151   :  { %v3412_v57 = vadd.f32 %v1146_v32, %v1033_v33  ;;  %v1148_v6 = vpop.f32.mrb[31].mxu0 }
 0x152   :  { %v3414_v18 = vadd.f32 %v1148_v6, %v1035_v54 }
 0x155   :  { %v1225_v37 = vpop.f32.mrb[32].mxu1 }
 0x156   :  { %v1185_v36 = vpop.f32.mrb[0].mxu0  ;;  %v3419_v47 = vadd.f32 %v1225_v37, %v1113_v28  ;;  %v1227_v29 = vpop.f32.mrb[33].mxu1 }
 0x157   :  { %v3417_v20 = vadd.f32 %v1185_v36, %v3360_v26  ;;  %v1187_v7 = vpop.f32.mrb[1].mxu0  ;;  %v3424_v15 = vadd.f32 %v1227_v29, %v1115_v9  ;;  %v1229_v1 = vpop.f32.mrb[34].mxu1 }
 0x158   :  { %v3422_v3 = vadd.f32 %v1187_v7, %v3362_v52  ;;  %v1189_v56 = vpop.f32.mrb[2].mxu0  ;;  %v3429_v45 = vadd.f32 %v1229_v1, %v1117_v30  ;;  %v1231_v26 = vpop.f32.mrb[35].mxu1 }
 0x159   :  { %v3427_v34 = vadd.f32 %v1189_v56, %v3364_v19  ;;  %v1191_v22 = vpop.f32.mrb[3].mxu0  ;;  %v3434_v53 = vadd.f32 %v1231_v26, %v1119_v17  ;;  %v1297_v19 = vsel %vm1264_vm0, %v3424_v15, 0.0  ;;  %v1346_v29 = vmul.f32 %v3424_v15, %v3424_v15 }
 0x15a   :  { %v3432_v28 = vadd.f32 %v1191_v22, %v3366_v58  ;;  %v1265_v52 = vsel %vm1264_vm0, %v3422_v3, 0.0  ;;  %v1298_v39 = vadd.f32 %v1297_v19, %v3419_v47  ;;  %v1330_v62 = vmul.f32 %v3422_v3, %v3422_v3 }
 0x15b   :  { %v1266_v9 = vadd.f32 %v3417_v20, %v1265_v52  ;;  %v1301_v0 = vsel %vm1264_vm0, %v3434_v53, 0.0  ;;  %v1348_v55 = vmul.f32 %v3434_v53, %v3434_v53  ;;  %v1331_v46 = vmul.f32 %v3427_v34, %v3427_v34 }
 0x15c   :  { %v1332_v30 = vmul.f32 %v3432_v28, %v3432_v28  ;;  %v1302_v58 = vadd.f32 %v1301_v0, %v3429_v45 }
 0x15d   :  { %1267 = vadd.xlane.f32.xlu0 %v1266_v9  ;;  %v1235_v17 = vpop.f32.mrb[36].mxu1  ;;  %v1397_v37 = vsel %vm1264_vm0, %v1348_v55, 0.0 }
 0x15e   :  { %v1195_v51 = vpop.f32.mrb[4].mxu0  ;;  %v1365_v41 = vsel %vm1264_vm0, %v1332_v30, 0.0  ;;  %v3453_v16 = vadd.f32 %v1235_v17, %v3392_v5  ;;  %v1237_v2 = vpop.f32.mrb[37].mxu1  ;;  %1303 = vadd.xlane.f32.xlu1 %v1302_v58  ;;  %v1269_v5 = vsel %vm1264_vm0, %v3432_v28, 0.0 }
 0x15f   :  { %v3450_v50 = vadd.f32 %v1195_v51, %v3368_v14  ;;  %v1197_v60 = vpop.f32.mrb[5].mxu0  ;;  %v3462_v35 = vadd.f32 %v1237_v2, %v3394_v4  ;;  %v1239_v14 = vpop.f32.mrb[38].mxu1  ;;  %v1366_v6 = vadd.f32 %v1365_v41, %v1331_v46  ;;  %v1270_v7 = vadd.f32 %v3427_v34, %v1269_v5 }
 0x160   :  { %v3459_v25 = vadd.f32 %v1197_v60, %v3370_v59  ;;  %v1199_v13 = vpop.f32.mrb[6].mxu0  ;;  %v3472_v32 = vadd.f32 %v1239_v14, %v3396_v21  ;;  %v1241_v59 = vpop.f32.mrb[39].mxu1  ;;  %v1361_v21 = vsel %vm1264_vm0, %v1330_v62, 0.0  ;;  %v1393_v41 = vsel %vm1264_vm0, %v1346_v29, 0.0 }
 0x161   :  { %v3469_v33 = vadd.f32 %v1199_v13, %v3372_v11  ;;  %v1201_v54 = vpop.f32.mrb[7].mxu0  ;;  %1299 = vadd.xlane.f32.xlu0 %v1298_v39  ;;  %v3478_v36 = vadd.f32 %v1241_v59, %v3398_v40  ;;  %v1347_v11 = vmul.f32 %v3429_v45, %v3429_v45  ;;  %v1305_v46 = vsel %vm1264_vm0, %v3462_v35, 0.0 }
 0x162   :  { %v3475_v4 = vadd.f32 %v1201_v54, %v3374_v61  ;;  %1367 = vadd.xlane.f32.xlu1 %v1366_v6  ;;  %v1329_v61 = vmul.f32 %v3417_v20, %v3417_v20  ;;  %v1273_v22 = vsel %vm1264_vm0, %v3459_v25, 0.0  ;;  %v1334_v13 = vmul.f32 %v3459_v25, %v3459_v25 }
 0x163   :  { %v1398_v56 = vadd.f32 %v1397_v37, %v1347_v11  ;;  %v1274_v2 = vadd.f32 %v3450_v50, %v1273_v22 }
 0x164   :  { %v1362_v19 = vadd.f32 %v1361_v21, %v1329_v61  ;;  %v1336_v62 = vmul.f32 %v3475_v4, %v3475_v4  ;;  %v1369_v61 = vsel %vm1264_vm0, %v1334_v13, 0.0 }
 0x165   :  { %1271 = vadd.xlane.f32.xlu0 %v1270_v7  ;;  %v1245_v1 = vpop.f32.mrb[40].mxu1  ;;  %v1306_v7 = vadd.f32 %v1305_v46, %v3453_v16 }
 0x166   :  { %v1205_v40 = vpop.f32.mrb[8].mxu0  ;;  %v3495_v52 = vadd.f32 %v1245_v1, %v3400_v43  ;;  %v1247_v0 = vpop.f32.mrb[41].mxu1  ;;  %1399 = vadd.xlane.f32.xlu1 %v1398_v56 }
 0x167   :  { %v3492_v26 = vadd.f32 %v1205_v40, %v3376_v48  ;;  %v1207_v9 = vpop.f32.mrb[9].mxu0  ;;  %v3501_v58 = vadd.f32 %v1247_v0, %v3402_v38  ;;  %v1249_v17 = vpop.f32.mrb[42].mxu1 }
 0x168   :  { %v3498_v30 = vadd.f32 %v1207_v9, %v3378_v63  ;;  %v1209_v51 = vpop.f32.mrb[10].mxu0  ;;  %v3508_v43 = vadd.f32 %v1249_v17, %v3404_v23  ;;  %v1251_v60 = vpop.f32.mrb[43].mxu1  ;;  %v1345_v63 = vmul.f32 %v3419_v47, %v3419_v47 }
 0x169   :  { %v3505_v48 = vadd.f32 %v1209_v51, %v3380_v24  ;;  %v1211_v55 = vpop.f32.mrb[11].mxu0  ;;  %1363 = vadd.xlane.f32.xlu0 %v1362_v19  ;;  %v3517_v39 = vadd.f32 %v1251_v60, %v3406_v10  ;;  %v1277_v24 = vsel %vm1264_vm0, %v3475_v4, 0.0  ;;  %v1309_v10 = vsel %vm1264_vm0, %v3478_v36, 0.0 }
 0x16a   :  { %v3514_v38 = vadd.f32 %v1211_v55, %v3382_v12  ;;  %1275 = vadd.xlane.f32.xlu1 %v1274_v2  ;;  %v1394_v23 = vadd.f32 %v1393_v41, %v1345_v63  ;;  %v1278_v14 = vadd.f32 %v3469_v33, %v1277_v24  ;;  %v1335_v51 = vmul.f32 %v3469_v33, %v3469_v33 }
 0x16b   :  { %v1351_v60 = vmul.f32 %v3472_v32, %v3472_v32  ;;  %v1281_v2 = vsel %vm1264_vm0, %v3498_v30, 0.0  ;;  %v1313_v46 = vsel %vm1264_vm0, %v3501_v58, 0.0  ;;  %v1338_v13 = vmul.f32 %v3498_v30, %v3498_v30 }
 0x16c   :  { %v1285_v24 = vsel %vm1264_vm0, %v3514_v38, 0.0 }
 0x16d   :  { %1395 = vadd.xlane.f32.xlu0 %v1394_v23  ;;  %v1255_v12 = vpop.f32.mrb[44].mxu1  ;;  %v1282_v23 = vadd.f32 %v3492_v26, %v1281_v2 }
 0x16e   :  { %v1215_v5 = vpop.f32.mrb[12].mxu0  ;;  %v3534_v59 = vadd.f32 %v1255_v12, %v3408_v42  ;;  %v1257_v37 = vpop.f32.mrb[45].mxu1  ;;  %1279 = vadd.xlane.f32.xlu1 %v1278_v14  ;;  %v1286_v14 = vadd.f32 %v3505_v48, %v1285_v24  ;;  %v1340_v12 = vmul.f32 %v3514_v38, %v3514_v38 }
 0x16f   :  { %v3531_v54 = vadd.f32 %v1215_v5, %v3384_v8  ;;  %v1217_v6 = vpop.f32.mrb[13].mxu0  ;;  %v3541_v21 = vadd.f32 %v1257_v37, %v3410_v44  ;;  %v1259_v56 = vpop.f32.mrb[46].mxu1  ;;  %v1350_v8 = vmul.f32 %v3462_v35, %v3462_v35  ;;  %v1333_v44 = vmul.f32 %v3450_v50, %v3450_v50 }
 0x170   :  { %v3538_v11 = vadd.f32 %v1217_v6, %v3386_v27  ;;  %v1219_v29 = vpop.f32.mrb[14].mxu0  ;;  %v3550_v40 = vadd.f32 %v1259_v56, %v3412_v57  ;;  %v1261_v22 = vpop.f32.mrb[47].mxu1  ;;  %v1310_v27 = vadd.f32 %v1309_v10, %v3472_v32  ;;  %v1352_v57 = vmul.f32 %v3478_v36, %v3478_v36 }
 0x171   :  { %v3547_v42 = vadd.f32 %v1219_v29, %v3388_v49  ;;  %v1221_v1 = vpop.f32.mrb[15].mxu0  ;;  %1307 = vadd.xlane.f32.xlu0 %v1306_v7  ;;  %v3559_v0 = vadd.f32 %v1261_v22, %v3414_v18  ;;  %v1373_v49 = vsel %vm1264_vm0, %v1336_v62, 0.0  ;;  %v1370_v19 = vadd.f32 %v1369_v61, %v1333_v44 }
 0x172   :  { %v3556_v9 = vadd.f32 %v1221_v1, %v3390_v31  ;;  %1311 = vadd.xlane.f32.xlu1 %v1310_v27  ;;  %v1401_v17 = vsel %vm1264_vm0, %v1350_v8, 0.0  ;;  %v1374_v41 = vadd.f32 %v1373_v49, %v1335_v51  ;;  %v1349_v31 = vmul.f32 %v3453_v16, %v3453_v16 }
 0x173   :  { %v1405_v18 = vsel %vm1264_vm0, %v1352_v57, 0.0  ;;  %v1317_v5 = vsel %vm1264_vm0, %v3517_v39, 0.0  ;;  %v1314_v10 = vadd.f32 %v1313_v46, %v3495_v52  ;;  %v1377_v62 = vsel %vm1264_vm0, %v1338_v13, 0.0 }
 0x174   :  { %v1402_v55 = vadd.f32 %v1401_v17, %v1349_v31  ;;  %v1406_v63 = vadd.f32 %v1405_v18, %v1351_v60  ;;  %v1354_v6 = vmul.f32 %v3501_v58, %v3501_v58  ;;  %v1318_v37 = vadd.f32 %v1317_v5, %v3508_v43 }
 0x175   :  { %1371 = vadd.xlane.f32.xlu0 %v1370_v19  ;;  %v1337_v7 = vmul.f32 %v3492_v26, %v3492_v26  ;;  %v1381_v29 = vsel %vm1264_vm0, %v1340_v12, 0.0  ;;  %v1356_v56 = vmul.f32 %v3517_v39, %v3517_v39  ;;  %v1339_v8 = vmul.f32 %v3505_v48, %v3505_v48 }
 0x176   :  { %1375 = vadd.xlane.f32.xlu1 %v1374_v41  ;;  %v1409_v1 = vsel %vm1264_vm0, %v1354_v6, 0.0  ;;  %v1353_v27 = vmul.f32 %v3495_v52, %v3495_v52  ;;  %v1355_v57 = vmul.f32 %v3508_v43, %v3508_v43  ;;  %v1289_v19 = vsel %vm1264_vm0, %v3538_v11, 0.0 }
 0x177   :  { %v1378_v61 = vadd.f32 %v1377_v62, %v1337_v7  ;;  %v1382_v22 = vadd.f32 %v1381_v29, %v1339_v8  ;;  %v1413_v44 = vsel %vm1264_vm0, %v1356_v56, 0.0  ;;  %v1293_v17 = vsel %vm1264_vm0, %v3556_v9, 0.0 }
 0x178   :  { %v1410_v49 = vadd.f32 %v1409_v1, %v1353_v27  ;;  %v1414_v51 = vadd.f32 %v1413_v44, %v1355_v57  ;;  %v1290_v41 = vadd.f32 %v3531_v54, %v1289_v19  ;;  %v1321_v31 = vsel %vm1264_vm0, %v3541_v21, 0.0 }
 0x179   :  { %1403 = vadd.xlane.f32.xlu0 %v1402_v55  ;;  %v1342_v18 = vmul.f32 %v3538_v11, %v3538_v11  ;;  %v1294_v55 = vadd.f32 %v3547_v42, %v1293_v17  ;;  %v1325_v60 = vsel %vm1264_vm0, %v3559_v0, 0.0  ;;  %v1344_v2 = vmul.f32 %v3556_v9, %v3556_v9 }
 0x17a   :  { %1407 = vadd.xlane.f32.xlu1 %v1406_v63  ;;  %v2393_v63 = vmov 0   ;;  %v1322_v24 = vadd.f32 %v1321_v31, %v3534_v59  ;;  %v1358_v46 = vmul.f32 %v3541_v21, %v3541_v21  ;;  %v1326_v13 = vadd.f32 %v1325_v60, %v3550_v40 }
 0x17b   :  { %2211 = vset.pattern.permute.xlu0 %v2393_v63  ;;  %2212 = vset.pattern.permute.xlu1 %v2393_v63  ;;  %v1389_v5 = vsel %vm1264_vm0, %v1344_v2, 0.0  ;;  %v1360_v12 = vmul.f32 %v3559_v0, %v3559_v0  ;;  %v1343_v62 = vmul.f32 %v3547_v42, %v3547_v42  ;;  %v1357_v7 = vmul.f32 %v3534_v59, %v3534_v59 }
 0x17c   :  { %v1417_v6 = vsel %vm1264_vm0, %v1358_v46, 0.0 }
 0x17d   :  { %1283 = vadd.xlane.f32.xlu0 %v1282_v23  ;;  %v1385_v23 = vsel %vm1264_vm0, %v1342_v18, 0.0  ;;  %v1421_v29 = vsel %vm1264_vm0, %v1360_v12, 0.0  ;;  %v1418_v56 = vadd.f32 %v1417_v6, %v1357_v7 }
 0x17e   :  { %1287 = vadd.xlane.f32.xlu1 %v1286_v14  ;;  %v1341_v14 = vmul.f32 %v3531_v54, %v3531_v54 }
 0x181   :  { %1315 = vadd.xlane.f32.xlu0 %v1314_v10  ;;  %v1386_v10 = vadd.f32 %v1385_v23, %v1341_v14 }
 0x182   :  { %1319 = vadd.xlane.f32.xlu1 %v1318_v37  ;;  %v1390_v37 = vadd.f32 %v1389_v5, %v1343_v62 }
 0x185   :  { %1379 = vadd.xlane.f32.xlu0 %v1378_v61  ;;  %v1359_v61 = vmul.f32 %v3550_v40, %v3550_v40 }
 0x186   :  { %1383 = vadd.xlane.f32.xlu1 %v1382_v22 }
 0x187   :  { %v1422_v8 = vadd.f32 %v1421_v29, %v1359_v61 }
 0x189   :  { %1411 = vadd.xlane.f32.xlu0 %v1410_v49 }
 0x18a   :  { %1415 = vadd.xlane.f32.xlu1 %v1414_v51 }
 0x18d   :  { %1291 = vadd.xlane.f32.xlu0 %v1290_v41 }
 0x18e   :  { %1295 = vadd.xlane.f32.xlu1 %v1294_v55 }
 0x191   :  { %1323 = vadd.xlane.f32.xlu0 %v1322_v24 }
 0x192   :  { %1327 = vadd.xlane.f32.xlu1 %v1326_v13 }
 0x195   :  { %1387 = vadd.xlane.f32.xlu0 %v1386_v10 }
 0x196   :  { %1391 = vadd.xlane.f32.xlu1 %v1390_v37 }
 0x199   :  { %1419 = vadd.xlane.f32.xlu0 %v1418_v56 }
 0x19a   :  { %1423 = vadd.xlane.f32.xlu1 %v1422_v8 }
 0x1ea   :  { %v1268_v1 = vpop.xlane.xlu0 %1267 }
 0x1eb   :  { %v3636_v22 = vmul.f32 0.0051020407, %v1268_v1  ;;  %v1304_v27 = vpop.xlane.xlu1 %1303 }
 0x1ec   :  { %v3643_v44 = vmul.f32 0.0051020407, %v1304_v27 }
 0x1ed   :  { %1941 = vst.msk [vmem:[%s4079_s6] sm:$0xff] %vm1940_vm1, %v3636_v22  ;;  %v1457_v23 = vmul.f32 %v3636_v22, %v3636_v22 }
 0x1ee   :  { %v1300_v49 = vpop.xlane.xlu0 %1299  ;;  %1950 = vst.msk [vmem:[%s4079_s6 + $0x48] sm:$0xff] %vm1940_vm1, %v3643_v44  ;;  %v1466_v55 = vmul.f32 %v3643_v44, %v3643_v44 }
 0x1ef   :  { %v3650_v57 = vmul.f32 0.0051020407, %v1300_v49  ;;  %v1368_v19 = vpop.xlane.xlu1 %1367 }
 0x1f0   :  { %v1442_v31 = vmul.f32 0.0051020407, %v1368_v19 }
 0x1f1   :  { %1949 = vst.msk [vmem:[%s4079_s6 + $0x40] sm:$0xff] %vm1940_vm1, %v3650_v57  ;;  %v1465_v10 = vmul.f32 %v3650_v57, %v3650_v57 }
 0x1f2   :  { %v1272_v51 = vpop.xlane.xlu0 %1271 }
 0x1f3   :  { %v3657_v17 = vmul.f32 0.0051020407, %v1272_v51  ;;  %v1400_v41 = vpop.xlane.xlu1 %1399 }
 0x1f4   :  { %v1450_v60 = vmul.f32 0.0051020407, %v1400_v41 }
 0x1f5   :  { %v1458_v18 = vmul.f32 %v3657_v17, %v3657_v17  ;;  %1942 = vst.msk [vmem:[%s4079_s6 + $0x8] sm:$0xff] %vm1940_vm1, %v3657_v17 }
 0x1f6   :  { %v1364_v2 = vpop.xlane.xlu0 %1363  ;;  %v1482_v24 = vsub.f32 %v1450_v60, %v1466_v55  ;;  %v1522_v60 = vld [vmem:[%s4081_s3 + $0x8] sm:$0xff] }
 0x1f7   :  { %v1474_v63 = vsub.f32 %v1442_v31, %v1458_v18  ;;  %v1441_v46 = vmul.f32 0.0051020407, %v1364_v2  ;;  %v1276_v13 = vpop.xlane.xlu1 %1275 }
 0x1f8   :  { %1966 = vst.msk [vmem:[%s4080_s7 + $0x48] sm:$0xff] %vm1940_vm1, %v1482_v24  ;;  %v3678_v12 = vmul.f32 0.0051020407, %v1276_v13  ;;  %v1498_v6 = vadd.f32 0.001, %v1482_v24 }
 0x1f9   :  { %v1490_v14 = vadd.f32 0.001, %v1474_v63  ;;  %1958 = vst.msk [vmem:[%s4080_s7 + $0x8] sm:$0xff] %vm1940_vm1, %v1474_v63  ;;  %v1473_v5 = vsub.f32 %v1441_v46, %v1457_v23  ;;  %v1521_v23 = vld [vmem:[%s4081_s3] sm:$0xff] }
 0x1fa   :  { %v1396_v62 = vpop.xlane.xlu0 %1395  ;;  %1943 = vst.msk [vmem:[%s4079_s6 + $0x10] sm:$0xff] %vm1940_vm1, %v3678_v12  ;;  %v1459_v41 = vmul.f32 %v3678_v12, %v3678_v12 }
 0x1fb   :  { %2361 = vrsqrt.f32 %v1490_v14  ;;  %v1489_v37 = vadd.f32 0.001, %v1473_v5  ;;  %1957 = vst.msk [vmem:[%s4080_s7] sm:$0xff] %vm1940_vm1, %v1473_v5  ;;  %v1449_v7 = vmul.f32 0.0051020407, %v1396_v62  ;;  %v1280_v29 = vpop.xlane.xlu1 %1279 }
 0x1fc   :  { %v3691_v61 = vmul.f32 0.0051020407, %v1280_v29 }
 0x1fd   :  { %2363 = vrsqrt.f32 %v1489_v37  ;;  %v1481_v56 = vsub.f32 %v1449_v7, %v1465_v10 }
 0x1fe   :  { %v1308_v8 = vpop.xlane.xlu0 %1307  ;;  %2365 = vrsqrt.f32 %v1498_v6  ;;  %1944 = vst.msk [vmem:[%s4079_s6 + $0x18] sm:$0xff] %vm1940_vm1, %v3691_v61  ;;  %v1460_v63 = vmul.f32 %v3691_v61, %v3691_v61 }
 0x1ff   :  { %v1497_v1 = vadd.f32 0.001, %v1481_v56  ;;  %1965 = vst.msk [vmem:[%s4080_s7 + $0x40] sm:$0xff] %vm1940_vm1, %v1481_v56  ;;  %v3702_v27 = vmul.f32 0.0051020407, %v1308_v8  ;;  %v1312_v49 = vpop.xlane.xlu1 %1311 }
 0x200   :  { %v3709_v19 = vmul.f32 0.0051020407, %v1312_v49  ;;  %v1530_v49 = vld [vmem:[%s4081_s3 + $0x48] sm:$0xff] }
 0x201   :  { %2367 = vrsqrt.f32 %v1497_v1  ;;  %1951 = vst.msk [vmem:[%s4079_s6 + $0x50] sm:$0xff] %vm1940_vm1, %v3702_v27  ;;  %v1467_v5 = vmul.f32 %v3702_v27, %v3702_v27 }
 0x202   :  { %v1372_v51 = vpop.xlane.xlu0 %1371  ;;  %1952 = vst.msk [vmem:[%s4079_s6 + $0x58] sm:$0xff] %vm1940_vm1, %v3709_v19  ;;  %v1468_v8 = vmul.f32 %v3709_v19, %v3709_v19 }
 0x203   :  { %v1443_v31 = vmul.f32 0.0051020407, %v1372_v51  ;;  %v1376_v18 = vpop.xlane.xlu1 %1375  ;;  %v1529_v51 = vld [vmem:[%s4081_s3 + $0x40] sm:$0xff] }
 0x204   :  { %v1444_v24 = vmul.f32 0.0051020407, %v1376_v18 }
 0x205   :  { %v2362_v55 = vpop.eup %2361  ;;  %v1475_v2 = vsub.f32 %v1443_v31, %v1459_v41 }
 0x206   :  { %v1404_v46 = vpop.xlane.xlu0 %1403  ;;  %v1476_v14 = vsub.f32 %v1444_v24, %v1460_v63  ;;  %v1538_v62 = vmul.f32 %v2362_v55, %v1522_v60 }
 0x207   :  { %v2364_v13 = vpop.eup %2363  ;;  %1959 = vst.msk [vmem:[%s4080_s7 + $0x10] sm:$0xff] %vm1940_vm1, %v1475_v2  ;;  %v1451_v10 = vmul.f32 0.0051020407, %v1404_v46  ;;  %v1408_v6 = vpop.xlane.xlu1 %1407  ;;  %v1491_v41 = vadd.f32 0.001, %v1475_v2 }
 0x208   :  { %v1537_v37 = vmul.f32 %v2364_v13, %v1521_v23  ;;  %v2366_v7 = vpop.eup %2365  ;;  %v1492_v29 = vadd.f32 0.001, %v1476_v14  ;;  %1960 = vst.msk [vmem:[%s4080_s7 + $0x18] sm:$0xff] %vm1940_vm1, %v1476_v14  ;;  %v1452_v1 = vmul.f32 0.0051020407, %v1408_v6  ;;  %v1570_v63 = vmul.f32 %v1538_v62, %v3657_v17  ;;  %v1554_v17 = vld [vmem:[%s4082_s4 + $0x8] sm:$0xff] }
 0x209   :  { %v1483_v56 = vsub.f32 %v1451_v10, %v1467_v5  ;;  %v1546_v23 = vmul.f32 %v2366_v7, %v1530_v49  ;;  %v1553_v49 = vld [vmem:[%s4082_s4] sm:$0xff] }
 0x20a   :  { %1603 = vperm.xlu0 %2211, %v1537_v37   ;;  %v1284_v31 = vpop.xlane.xlu0 %1283  ;;  %2369 = vrsqrt.f32 %v1492_v29  ;;  %v1484_v55 = vsub.f32 %v1452_v1, %v1468_v8  ;;  %v1586_v7 = vsub.f32 %v1554_v17, %v1570_v63  ;;  %v1569_v8 = vmul.f32 %v1537_v37, %v3636_v22  ;;  %v1562_v1 = vld [vmem:[%s4082_s4 + $0x48] sm:$0xff] }
 0x20b   :  { %v2368_v18 = vpop.eup %2367  ;;  %1967 = vst.msk [vmem:[%s4080_s7 + $0x50] sm:$0xff] %vm1940_vm1, %v1483_v56  ;;  %v3748_v60 = vmul.f32 0.0051020407, %v1284_v31  ;;  %v1288_v24 = vpop.xlane.xlu1 %1287  ;;  %2371 = vrsqrt.f32 %v1491_v41  ;;  %v1499_v5 = vadd.f32 0.001, %v1483_v56  ;;  %v1578_v29 = vmul.f32 %v1546_v23, %v3643_v44 }
 0x20c   :  { %v1545_v46 = vmul.f32 %v2368_v18, %v1529_v51  ;;  %v1500_v13 = vadd.f32 0.001, %v1484_v55  ;;  %1968 = vst.msk [vmem:[%s4080_s7 + $0x58] sm:$0xff] %vm1940_vm1, %v1484_v55  ;;  %v3760_v2 = vmul.f32 0.0051020407, %v1288_v24  ;;  %v1524_v51 = vld [vmem:[%s4081_s3 + $0x18] sm:$0xff]  ;;  %v1585_v18 = vsub.f32 %v1553_v49, %v1569_v8 }
 0x20d   :  { %1945 = vst.msk [vmem:[%s4079_s6 + $0x20] sm:$0xff] %vm1940_vm1, %v3748_v60  ;;  %v1461_v22 = vmul.f32 %v3748_v60, %v3748_v60  ;;  %v1594_v31 = vsub.f32 %v1562_v1, %v1578_v29 }
 0x20e   :  { %1648 = vperm.xlu0 %2211, %v1546_v23   ;;  %v1316_v14 = vpop.xlane.xlu0 %1315  ;;  %1643 = vperm.xlu1 %2212, %v1545_v46   ;;  %2373 = vrsqrt.f32 %v1500_v13  ;;  %1946 = vst.msk [vmem:[%s4079_s6 + $0x28] sm:$0xff] %vm1940_vm1, %v3760_v2  ;;  %v1462_v24 = vmul.f32 %v3760_v2, %v3760_v2  ;;  %v1561_v13 = vld [vmem:[%s4082_s4 + $0x40] sm:$0xff] }
 0x20f   :  { %v3770_v10 = vmul.f32 0.0051020407, %v1316_v14  ;;  %v1320_v6 = vpop.xlane.xlu1 %1319  ;;  %2375 = vrsqrt.f32 %v1499_v5 }
 0x210   :  { %v3779_v56 = vmul.f32 0.0051020407, %v1320_v6  ;;  %v1532_v6 = vld [vmem:[%s4081_s3 + $0x58] sm:$0xff] }
 0x211   :  { %1953 = vst.msk [vmem:[%s4079_s6 + $0x60] sm:$0xff] %vm1940_vm1, %v3770_v10 }
 0x212   :  { %1720 = vperm.xlu0 %2211, %v1586_v7   ;;  %v1380_v44 = vpop.xlane.xlu0 %1379  ;;  %1608 = vperm.xlu1 %2212, %v1538_v62   ;;  %1954 = vst.msk [vmem:[%s4079_s6 + $0x68] sm:$0xff] %vm1940_vm1, %v3779_v56  ;;  %v1577_v62 = vmul.f32 %v1545_v46, %v3650_v57  ;;  %v1469_v46 = vmul.f32 %v3770_v10, %v3770_v10 }
 0x213   :  { %v1445_v37 = vmul.f32 0.0051020407, %v1380_v44  ;;  %v1384_v41 = vpop.xlane.xlu1 %1383 }
 0x214   :  { %v2370_v55 = vpop.eup %2369  ;;  %v1446_v23 = vmul.f32 0.0051020407, %v1384_v41  ;;  %v1593_v8 = vsub.f32 %v1561_v13, %v1577_v62 }
 0x215   :  { %v1477_v63 = vsub.f32 %v1445_v37, %v1461_v22  ;;  %v3803_v14 = vmul.f32 %v2370_v55, %v1524_v51  ;;  %v2372_v7 = vpop.eup %2371  ;;  %v1470_v22 = vmul.f32 %v3779_v56, %v3779_v56  ;;  %v1523_v51 = vld [vmem:[%s4081_s3 + $0x10] sm:$0xff] }
 0x216   :  { %1760 = vperm.xlu0 %2211, %v1594_v31   ;;  %v1412_v17 = vpop.xlane.xlu0 %1411  ;;  %1715 = vperm.xlu1 %2212, %v1585_v18   ;;  %v1478_v57 = vsub.f32 %v1446_v23, %v1462_v24  ;;  %v1556_v24 = vld [vmem:[%s4082_s4 + $0x18] sm:$0xff]  ;;  %v1539_v13 = vmul.f32 %v2372_v7, %v1523_v51 }
 0x217   :  { %1961 = vst.msk [vmem:[%s4080_s7 + $0x20] sm:$0xff] %vm1940_vm1, %v1477_v63  ;;  %v1453_v5 = vmul.f32 0.0051020407, %v1412_v17  ;;  %v1416_v29 = vpop.xlane.xlu1 %1415  ;;  %v1572_v18 = vmul.f32 %v3803_v14, %v3691_v61 }
 0x218   :  { %v2374_v1 = vpop.eup %2373  ;;  %v1494_v49 = vadd.f32 0.001, %v1478_v57  ;;  %1962 = vst.msk [vmem:[%s4080_s7 + $0x28] sm:$0xff] %vm1940_vm1, %v1478_v57  ;;  %v1454_v37 = vmul.f32 0.0051020407, %v1416_v29 }
 0x219   :  { %v1485_v44 = vsub.f32 %v1453_v5, %v1469_v46  ;;  %v1548_v31 = vmul.f32 %v2374_v1, %v1532_v6  ;;  %v2376_v17 = vpop.eup %2375  ;;  %v1531_v46 = vld [vmem:[%s4081_s3 + $0x50] sm:$0xff]  ;;  %v1588_v6 = vsub.f32 %v1556_v24, %v1572_v18  ;;  %v1493_v29 = vadd.f32 0.001, %v1477_v63  ;;  %v1564_v1 = vld [vmem:[%s4082_s4 + $0x58] sm:$0xff]  ;;  %v1526_v18 = vld [vmem:[%s4081_s3 + $0x28] sm:$0xff] }
 0x21a   :  { %v1292_v41 = vpop.xlane.xlu0 %1291  ;;  %1755 = vperm.xlu1 %2212, %v1593_v8   ;;  %2377 = vrsqrt.f32 %v1494_v49  ;;  %v1486_v62 = vsub.f32 %v1454_v37, %v1470_v22  ;;  %v1547_v22 = vmul.f32 %v2376_v17, %v1531_v46  ;;  %v1571_v24 = vmul.f32 %v1539_v13, %v3678_v12  ;;  %v1555_v46 = vld [vmem:[%s4082_s4 + $0x10] sm:$0xff] }
 0x21b   :  { %1969 = vst.msk [vmem:[%s4080_s7 + $0x60] sm:$0xff] %vm1940_vm1, %v1485_v44  ;;  %v3829_v55 = vmul.f32 0.0051020407, %v1292_v41  ;;  %v1296_v23 = vpop.xlane.xlu1 %1295  ;;  %1658 = vperm.xlu0 %2211, %v1548_v31   ;;  %v1580_v7 = vmul.f32 %v1548_v31, %v3709_v19  ;;  %v1501_v51 = vadd.f32 0.001, %v1485_v44 }
 0x21c   :  { %v1502_v57 = vadd.f32 0.001, %v1486_v62  ;;  %1970 = vst.msk [vmem:[%s4080_s7 + $0x68] sm:$0xff] %vm1940_vm1, %v1486_v62  ;;  %v3843_v61 = vmul.f32 0.0051020407, %v1296_v23 }
 0x21d   :  { %1947 = vst.msk [vmem:[%s4079_s6 + $0x30] sm:$0xff] %vm1940_vm1, %v3829_v55  ;;  %v1596_v37 = vsub.f32 %v1564_v1, %v1580_v7  ;;  %v1463_v41 = vmul.f32 %v3829_v55, %v3829_v55 }
 0x21e   :  { %v1324_v5 = vpop.xlane.xlu0 %1323  ;;  %1613 = vperm.xlu1 %2212, %v1539_v13   ;;  %2379 = vrsqrt.f32 %v1502_v57  ;;  %1948 = vst.msk [vmem:[%s4079_s6 + $0x38] sm:$0xff] %vm1940_vm1, %v3843_v61  ;;  %v1464_v17 = vmul.f32 %v3843_v61, %v3843_v61 }
 0x21f   :  { %v3854_v8 = vmul.f32 0.0051020407, %v1324_v5  ;;  %1730 = vperm.xlu0 %2211, %v1588_v6   ;;  %v1328_v49 = vpop.xlane.xlu1 %1327  ;;  %2381 = vrsqrt.f32 %v1493_v29  ;;  %v1534_v29 = vld [vmem:[%s4081_s3 + $0x68] sm:$0xff] }
 0x220   :  { %v3864_v19 = vmul.f32 0.0051020407, %v1328_v49  ;;  %2383 = vrsqrt.f32 %v1501_v51  ;;  %v1587_v49 = vsub.f32 %v1555_v46, %v1571_v24 }
 0x221   :  { %1955 = vst.msk [vmem:[%s4079_s6 + $0x70] sm:$0xff] %vm1940_vm1, %v3854_v8  ;;  %v1471_v13 = vmul.f32 %v3854_v8, %v3854_v8 }
 0x222   :  { %v1388_v63 = vpop.xlane.xlu0 %1387  ;;  %1653 = vperm.xlu1 %2212, %v1547_v22   ;;  %1956 = vst.msk [vmem:[%s4079_s6 + $0x78] sm:$0xff] %vm1940_vm1, %v3864_v19 }
 0x223   :  { %v1447_v31 = vmul.f32 0.0051020407, %v1388_v63  ;;  %1770 = vperm.xlu0 %2211, %v1596_v37   ;;  %v1392_v62 = vpop.xlane.xlu1 %1391 }
 0x224   :  { %v2378_v23 = vpop.eup %2377  ;;  %v1448_v57 = vmul.f32 0.0051020407, %v1392_v62 }
 0x225   :  { %v1479_v44 = vsub.f32 %v1447_v31, %v1463_v41  ;;  %v1542_v6 = vmul.f32 %v2378_v23, %v1526_v18  ;;  %v1472_v41 = vmul.f32 %v3864_v19, %v3864_v19  ;;  %v1563_v18 = vld [vmem:[%s4082_s4 + $0x50] sm:$0xff]  ;;  %v1558_v23 = vld [vmem:[%s4082_s4 + $0x28] sm:$0xff] }
 0x226   :  { %v1420_v5 = vpop.xlane.xlu0 %1419  ;;  %1618 = vperm.xlu1 %2212, %v3803_v14   ;;  %v1480_v12 = vsub.f32 %v1448_v57, %v1464_v17  ;;  %v1579_v14 = vmul.f32 %v1547_v22, %v3702_v27 }
 0x227   :  { %1963 = vst.msk [vmem:[%s4080_s7 + $0x30] sm:$0xff] %vm1940_vm1, %v1479_v44  ;;  %v1455_v7 = vmul.f32 0.0051020407, %v1420_v5  ;;  %v1424_v1 = vpop.xlane.xlu1 %1423  ;;  %v1574_v27 = vmul.f32 %v1542_v6, %v3760_v2  ;;  %v1525_v2 = vld [vmem:[%s4081_s3 + $0x20] sm:$0xff] }
 0x228   :  { %v2380_v63 = vpop.eup %2379  ;;  %v1496_v37 = vadd.f32 0.001, %v1480_v12  ;;  %1964 = vst.msk [vmem:[%s4080_s7 + $0x38] sm:$0xff] %vm1940_vm1, %v1480_v12  ;;  %v1456_v31 = vmul.f32 0.0051020407, %v1424_v1  ;;  %v1595_v17 = vsub.f32 %v1563_v18, %v1579_v14  ;;  %v1533_v1 = vld [vmem:[%s4081_s3 + $0x60] sm:$0xff] }
 0x229   :  { %v1487_v51 = vsub.f32 %v1455_v7, %v1471_v13  ;;  %v1550_v62 = vmul.f32 %v2380_v63, %v1534_v29  ;;  %v2382_v57 = vpop.eup %2381  ;;  %v1590_v5 = vsub.f32 %v1558_v23, %v1574_v27  ;;  %v1566_v13 = vld [vmem:[%s4082_s4 + $0x68] sm:$0xff]  ;;  %v1495_v14 = vadd.f32 0.001, %v1479_v44  ;;  %v1528_v63 = vld [vmem:[%s4081_s3 + $0x38] sm:$0xff] }
 0x22a   :  { %1725 = vperm.xlu1 %2212, %v1587_v49   ;;  %2385 = vrsqrt.f32 %v1496_v37  ;;  %v1488_v24 = vsub.f32 %v1456_v31, %v1472_v41  ;;  %v1541_v7 = vmul.f32 %v2382_v57, %v1525_v2  ;;  %v2384_v29 = vpop.eup %2383  ;;  %v1536_v18 = vld [vmem:[%s4081_s3 + $0x78] sm:$0xff] }
 0x22b   :  { %v1503_v22 = vadd.f32 0.001, %v1487_v51  ;;  %1971 = vst.msk [vmem:[%s4080_s7 + $0x70] sm:$0xff] %vm1940_vm1, %v1487_v51  ;;  %1668 = vperm.xlu0 %2211, %v1550_v62   ;;  %v1582_v12 = vmul.f32 %v1550_v62, %v3779_v56  ;;  %v1549_v56 = vmul.f32 %v2384_v29, %v1533_v1  ;;  %v1535_v51 = vld [vmem:[%s4081_s3 + $0x70] sm:$0xff] }
 0x22c   :  { %v1504_v46 = vadd.f32 0.001, %v1488_v24  ;;  %1972 = vst.msk [vmem:[%s4080_s7 + $0x78] sm:$0xff] %vm1940_vm1, %v1488_v24  ;;  %v1573_v44 = vmul.f32 %v1541_v7, %v3748_v60  ;;  %v1567_v24 = vld [vmem:[%s4082_s4 + $0x70] sm:$0xff]  ;;  %v1560_v60 = vld [vmem:[%s4082_s4 + $0x38] sm:$0xff] }
 0x22d   :  { %2387 = vrsqrt.f32 %v1503_v22  ;;  %v1598_v49 = vsub.f32 %v1566_v13, %v1582_v12  ;;  %v1557_v22 = vld [vmem:[%s4082_s4 + $0x20] sm:$0xff]  ;;  %v1581_v2 = vmul.f32 %v1549_v56, %v3770_v10  ;;  %v1527_v10 = vld [vmem:[%s4081_s3 + $0x30] sm:$0xff] }
 0x22e   :  { %1765 = vperm.xlu1 %2212, %v1595_v17   ;;  %2389 = vrsqrt.f32 %v1504_v46  ;;  %v1589_v46 = vsub.f32 %v1557_v22, %v1573_v44  ;;  %v1565_v12 = vld [vmem:[%s4082_s4 + $0x60] sm:$0xff] }
 0x22f   :  { %1740 = vperm.xlu0 %2211, %v1590_v5   ;;  %2391 = vrsqrt.f32 %v1495_v14 }
 0x232   :  { %1623 = vperm.xlu1 %2212, %v1541_v7  }
 0x233   :  { %1780 = vperm.xlu0 %2211, %v1598_v49  }
 0x234   :  { %v2386_v37 = vpop.eup %2385 }
 0x235   :  { %v1544_v41 = vmul.f32 %v2386_v37, %v1528_v63 }
 0x236   :  { %1663 = vperm.xlu1 %2212, %v1549_v56  }
 0x237   :  { %v2388_v31 = vpop.eup %2387  ;;  %v1576_v17 = vmul.f32 %v1544_v41, %v3843_v61  ;;  %v1568_v61 = vld [vmem:[%s4082_s4 + $0x78] sm:$0xff] }
 0x238   :  { %v1551_v62 = vmul.f32 %v2388_v31, %v1535_v51  ;;  %v2390_v27 = vpop.eup %2389 }
 0x239   :  { %v1552_v23 = vmul.f32 %v2390_v27, %v1536_v18  ;;  %v2392_v7 = vpop.eup %2391 }
 0x23a   :  { %1628 = vperm.xlu1 %2212, %v1542_v6   ;;  %v1583_v57 = vmul.f32 %v1551_v62, %v3854_v8  ;;  %v1592_v6 = vsub.f32 %v1560_v60, %v1576_v17  ;;  %v1597_v8 = vsub.f32 %v1565_v12, %v1581_v2  ;;  %v1543_v1 = vmul.f32 %v2392_v7, %v1527_v10 }
 0x23b   :  { %1678 = vperm.xlu0 %2211, %v1552_v23   ;;  %v1584_v13 = vmul.f32 %v1552_v23, %v3864_v19  ;;  %v1559_v19 = vld [vmem:[%s4082_s4 + $0x30] sm:$0xff] }
 0x23c   :  { %v1599_v5 = vsub.f32 %v1567_v24, %v1583_v57  ;;  %v1575_v49 = vmul.f32 %v1543_v1, %v3829_v55 }
 0x23d   :  { %v1600_v29 = vsub.f32 %v1568_v61, %v1584_v13 }
 0x23e   :  { %1735 = vperm.xlu1 %2212, %v1589_v46   ;;  %v1591_v14 = vsub.f32 %v1559_v19, %v1575_v49 }
 0x23f   :  { %1750 = vperm.xlu0 %2211, %v1592_v6  }
 0x242   :  { %1775 = vperm.xlu1 %2212, %v1597_v8  }
 0x243   :  { %1790 = vperm.xlu0 %2211, %v1600_v29  }
 0x246   :  { %1633 = vperm.xlu1 %2212, %v1543_v1  }
 0x24a   :  { %1673 = vperm.xlu1 %2212, %v1551_v62  }
 0x24e   :  { %1638 = vperm.xlu1 %2212, %v1544_v41  }
 0x252   :  { %1745 = vperm.xlu1 %2212, %v1591_v14  }
 0x256   :  { %1785 = vperm.xlu1 %2212, %v1599_v5  }
 0x289   :  { %v1604_v63 = vpop.permute.xlu0 %1603 }
 0x28a   :  { %v1681_v55 = vmul.f32 %v3417_v20, %v1604_v63  ;;  %v1682_v24 = vmul.f32 %v3422_v3, %v1604_v63 }
 0x28d   :  { %v1649_v56 = vpop.permute.xlu0 %1648  ;;  %v1644_v37 = vpop.permute.xlu1 %1643 }
 0x28e   :  { %v1699_v62 = vmul.f32 %v1649_v56, %v3429_v45  ;;  %v1700_v41 = vmul.f32 %v1649_v56, %v3434_v53  ;;  %v1697_v20 = vmul.f32 %v1644_v37, %v3419_v47  ;;  %v1698_v45 = vmul.f32 %v1644_v37, %v3424_v15 }
 0x291   :  { %v1721_v51 = vpop.permute.xlu0 %1720  ;;  %v1609_v31 = vpop.permute.xlu1 %1608 }
 0x292   :  { %v1683_v18 = vmul.f32 %v3427_v34, %v1609_v31  ;;  %v1684_v44 = vmul.f32 %v3432_v28, %v1609_v31 }
 0x294   :  { %v1795_v27 = vadd.f32 %v1721_v51, %v1683_v18  ;;  %v1796_v22 = vadd.f32 %v1721_v51, %v1684_v44 }
 0x295   :  { %v1761_v17 = vpop.permute.xlu0 %1760  ;;  %v1716_v57 = vpop.permute.xlu1 %1715 }
 0x296   :  { %v2099_v60 = vpack.c.bf16 %v1796_v22, %v1795_v27  ;;  %v1811_v34 = vadd.f32 %v1761_v17, %v1699_v62  ;;  %v1812_v46 = vadd.f32 %v1761_v17, %v1700_v41  ;;  %v1793_v28 = vadd.f32 %v1716_v57, %v1681_v55 }
 0x297   :  { %v1794_v2 = vadd.f32 %v1716_v57, %v1682_v24 }
 0x298   :  { %1925 = vst.msk [vmem:[%s4083_s5 + $0x8] sm:$0xff] %vm3966_vm4, %v2099_v60  ;;  %v2107_v3 = vpack.c.bf16 %v1812_v46, %v1811_v34 }
 0x299   :  { %v2098_v53 = vpack.c.bf16 %v1794_v2, %v1793_v28  ;;  %v1756_v5 = vpop.permute.xlu1 %1755 }
 0x29a   :  { %1933 = vst.msk [vmem:[%s4083_s5 + $0x48] sm:$0xff] %vm3966_vm4, %v2107_v3  ;;  %v1809_v12 = vadd.f32 %v1756_v5, %v1697_v20  ;;  %v1810_v6 = vadd.f32 %v1756_v5, %v1698_v45  ;;  %v1659_v47 = vpop.permute.xlu0 %1658 }
 0x29b   :  { %1924 = vst.msk [vmem:[%s4083_s5] sm:$0xff] %vm3966_vm4, %v2098_v53  ;;  %v1703_v7 = vmul.f32 %v1659_v47, %v3472_v32  ;;  %v1704_v10 = vmul.f32 %v1659_v47, %v3478_v36 }
 0x29c   :  { %v2106_v15 = vpack.c.bf16 %v1810_v6, %v1809_v12 }
 0x29d   :  { %v1614_v13 = vpop.permute.xlu1 %1613 }
 0x29e   :  { %1932 = vst.msk [vmem:[%s4083_s5 + $0x40] sm:$0xff] %vm3966_vm4, %v2106_v15  ;;  %v1731_v61 = vpop.permute.xlu0 %1730  ;;  %v1685_v37 = vmul.f32 %v3450_v50, %v1614_v13  ;;  %v1686_v51 = vmul.f32 %v3459_v25, %v1614_v13 }
 0x2a1   :  { %v1654_v8 = vpop.permute.xlu1 %1653 }
 0x2a2   :  { %v1771_v29 = vpop.permute.xlu0 %1770 }
 0x2a3   :  { %v1815_v1 = vadd.f32 %v1771_v29, %v1703_v7  ;;  %v1816_v49 = vadd.f32 %v1771_v29, %v1704_v10 }
 0x2a5   :  { %v1619_v19 = vpop.permute.xlu1 %1618  ;;  %v2109_v14 = vpack.c.bf16 %v1816_v49, %v1815_v1 }
 0x2a6   :  { %v1687_v63 = vmul.f32 %v3469_v33, %v1619_v19  ;;  %v1688_v56 = vmul.f32 %v3475_v4, %v1619_v19  ;;  %v1701_v33 = vmul.f32 %v1654_v8, %v3453_v16  ;;  %v1702_v4 = vmul.f32 %v1654_v8, %v3462_v35 }
 0x2a7   :  { %1935 = vst.msk [vmem:[%s4083_s5 + $0x58] sm:$0xff] %vm3966_vm4, %v2109_v14 }
 0x2a8   :  { %v1799_v32 = vadd.f32 %v1731_v61, %v1687_v63  ;;  %v1800_v36 = vadd.f32 %v1731_v61, %v1688_v56 }
 0x2a9   :  { %v1726_v31 = vpop.permute.xlu1 %1725 }
 0x2aa   :  { %v2101_v18 = vpack.c.bf16 %v1800_v36, %v1799_v32  ;;  %v1797_v44 = vadd.f32 %v1726_v31, %v1685_v37  ;;  %v1798_v55 = vadd.f32 %v1726_v31, %v1686_v51  ;;  %v1669_v62 = vpop.permute.xlu0 %1668 }
 0x2ab   :  { %v1707_v35 = vmul.f32 %v1669_v62, %v3508_v43  ;;  %v1708_v17 = vmul.f32 %v1669_v62, %v3517_v39 }
 0x2ac   :  { %1927 = vst.msk [vmem:[%s4083_s5 + $0x18] sm:$0xff] %vm3966_vm4, %v2101_v18  ;;  %v2100_v50 = vpack.c.bf16 %v1798_v55, %v1797_v44 }
 0x2ad   :  { %v1766_v25 = vpop.permute.xlu1 %1765 }
 0x2ae   :  { %1926 = vst.msk [vmem:[%s4083_s5 + $0x10] sm:$0xff] %vm3966_vm4, %v2100_v50  ;;  %v1813_v41 = vadd.f32 %v1766_v25, %v1701_v33  ;;  %v1814_v27 = vadd.f32 %v1766_v25, %v1702_v4  ;;  %v1741_v22 = vpop.permute.xlu0 %1740 }
 0x2b0   :  { %v2108_v16 = vpack.c.bf16 %v1814_v27, %v1813_v41 }
 0x2b1   :  { %v1624_v24 = vpop.permute.xlu1 %1623 }
 0x2b2   :  { %1934 = vst.msk [vmem:[%s4083_s5 + $0x50] sm:$0xff] %vm3966_vm4, %v2108_v16  ;;  %v1781_v57 = vpop.permute.xlu0 %1780  ;;  %v1689_v45 = vmul.f32 %v3492_v26, %v1624_v24  ;;  %v1690_v3 = vmul.f32 %v3498_v30, %v1624_v24 }
 0x2b3   :  { %v1819_v60 = vadd.f32 %v1781_v57, %v1707_v35  ;;  %v1820_v34 = vadd.f32 %v1781_v57, %v1708_v17 }
 0x2b5   :  { %v1664_v46 = vpop.permute.xlu1 %1663  ;;  %v2111_v28 = vpack.c.bf16 %v1820_v34, %v1819_v60 }
 0x2b6   :  { %v1705_v61 = vmul.f32 %v1664_v46, %v3495_v52  ;;  %v1706_v8 = vmul.f32 %v1664_v46, %v3501_v58 }
 0x2b7   :  { %1937 = vst.msk [vmem:[%s4083_s5 + $0x68] sm:$0xff] %vm3966_vm4, %v2111_v28 }
 0x2b9   :  { %v1629_v43 = vpop.permute.xlu1 %1628 }
 0x2ba   :  { %v1691_v39 = vmul.f32 %v3505_v48, %v1629_v43  ;;  %v1692_v2 = vmul.f32 %v3514_v38, %v1629_v43  ;;  %v1679_v20 = vpop.permute.xlu0 %1678 }
 0x2bb   :  { %v1711_v30 = vmul.f32 %v1679_v20, %v3550_v40  ;;  %v1712_v38 = vmul.f32 %v1679_v20, %v3559_v0 }
 0x2bc   :  { %v1803_v53 = vadd.f32 %v1741_v22, %v1691_v39  ;;  %v1804_v5 = vadd.f32 %v1741_v22, %v1692_v2 }
 0x2bd   :  { %v1736_v12 = vpop.permute.xlu1 %1735 }
 0x2be   :  { %v2103_v6 = vpack.c.bf16 %v1804_v5, %v1803_v53  ;;  %v1801_v47 = vadd.f32 %v1736_v12, %v1689_v45  ;;  %v1802_v15 = vadd.f32 %v1736_v12, %v1690_v3  ;;  %v1751_v13 = vpop.permute.xlu0 %1750 }
 0x2c0   :  { %1929 = vst.msk [vmem:[%s4083_s5 + $0x28] sm:$0xff] %vm3966_vm4, %v2103_v6  ;;  %v2102_v26 = vpack.c.bf16 %v1802_v15, %v1801_v47 }
 0x2c1   :  { %v1776_v48 = vpop.permute.xlu1 %1775 }
 0x2c2   :  { %1928 = vst.msk [vmem:[%s4083_s5 + $0x20] sm:$0xff] %vm3966_vm4, %v2102_v26  ;;  %v1817_v52 = vadd.f32 %v1776_v48, %v1705_v61  ;;  %v1818_v58 = vadd.f32 %v1776_v48, %v1706_v8  ;;  %v1791_v7 = vpop.permute.xlu0 %1790 }
 0x2c3   :  { %v1823_v29 = vadd.f32 %v1791_v7, %v1711_v30  ;;  %v1824_v1 = vadd.f32 %v1791_v7, %v1712_v38 }
 0x2c4   :  { %v2110_v10 = vpack.c.bf16 %v1818_v58, %v1817_v52 }
 0x2c5   :  { %v1634_v49 = vpop.permute.xlu1 %1633  ;;  %v2113_v40 = vpack.c.bf16 %v1824_v1, %v1823_v29 }
 0x2c6   :  { %1936 = vst.msk [vmem:[%s4083_s5 + $0x60] sm:$0xff] %vm3966_vm4, %v2110_v10  ;;  %v1693_v56 = vmul.f32 %v3531_v54, %v1634_v49  ;;  %v1694_v37 = vmul.f32 %v3538_v11, %v1634_v49 }
 0x2c7   :  { %1939 = vst.msk [vmem:[%s4083_s5 + $0x78] sm:$0xff] %vm3966_vm4, %v2113_v40 }
 0x2c9   :  { %v1674_v0 = vpop.permute.xlu1 %1673 }
 0x2ca   :  { %v1709_v55 = vmul.f32 %v1674_v0, %v3534_v59  ;;  %v1710_v62 = vmul.f32 %v1674_v0, %v3541_v21 }
 0x2cd   :  { %v1639_v19 = vpop.permute.xlu1 %1638 }
 0x2ce   :  { %v1695_v14 = vmul.f32 %v3547_v42, %v1639_v19  ;;  %v1696_v63 = vmul.f32 %v3556_v9, %v1639_v19 }
 0x2d0   :  { %v1807_v51 = vadd.f32 %v1751_v13, %v1695_v14  ;;  %v1808_v32 = vadd.f32 %v1751_v13, %v1696_v63 }
 0x2d1   :  { %v1746_v36 = vpop.permute.xlu1 %1745 }
 0x2d2   :  { %v2105_v31 = vpack.c.bf16 %v1808_v32, %v1807_v51  ;;  %v1805_v18 = vadd.f32 %v1746_v36, %v1693_v56  ;;  %v1806_v44 = vadd.f32 %v1746_v36, %v1694_v37 }
 0x2d4   :  { %1931 = vst.msk [vmem:[%s4083_s5 + $0x38] sm:$0xff] %vm3966_vm4, %v2105_v31  ;;  %v2104_v42 = vpack.c.bf16 %v1806_v44, %v1805_v18 }
 0x2d5   :  { %v1786_v54 = vpop.permute.xlu1 %1785 }
 0x2d6   :  { %1930 = vst.msk [vmem:[%s4083_s5 + $0x30] sm:$0xff] %vm3966_vm4, %v2104_v42  ;;  %v1821_v11 = vadd.f32 %v1786_v54, %v1709_v55  ;;  %v1822_v9 = vadd.f32 %v1786_v54, %v1710_v62 }
 0x2d8   :  { %v2112_v33 = vpack.c.bf16 %v1822_v9, %v1821_v11 }
 0x2da   :  { %1938 = vst.msk [vmem:[%s4083_s5 + $0x70] sm:$0xff] %vm3966_vm4, %v2112_v33 }

</bundles_post_ra>
